<compile_context>
chip_gen: v5e
topology: v5e:2x2
jax: 0.10.0
libtpu: 0.0.40
codegen_flags: <defaults>
</compile_context>

<pallas_src>
import math
import functools

import jax
import jax.numpy as jnp
from jax.experimental import pallas as pl
from jax.experimental.pallas import tpu as pltpu


# ----------------------------- fused Pallas kernel ---------------------------

def _cross_block_kernel(y_ref, z_ref,
                        wq_ref, wk_ref, wv_ref, wo_ref,
                        cw_ref, cb_ref,
                        yo_ref, zo_ref,
                        *, numcross, numconv1, scale, seq_len):
    """Fused CrossBlock forward for one batch element.

    y_ref, z_ref, yo_ref, zo_ref : (1, L, Dp)  f32
    wq/wk/wv/wo_ref              : (2*numcross, Dp, Dp)     bf16
    cw_ref                       : (2*numconv1, 3, Dp, Dp)  bf16
    cb_ref                       : (2*numconv1, 1, Dp)      f32
    """
    y = y_ref[0]                                   # (L, Dp) f32
    z = z_ref[0]
    L = seq_len

    # (L, 1) edge masks for the size-3 conv (zero-pad the sequence ends).
    row = jax.lax.broadcasted_iota(jnp.int32, (L, 1), 0)
    m_prev = (row > 0).astype(jnp.float32)         # zero out row 0  (x[l-1])
    m_next = (row < L - 1).astype(jnp.float32)     # zero out row L-1 (x[l+1])

    def cross(a, b, li):
        """Residual single-head cross-attention: attend from a to b."""
        a_b = a.astype(jnp.bfloat16)
        b_b = b.astype(jnp.bfloat16)
        q = jnp.dot(a_b, wq_ref[li], preferred_element_type=jnp.float32)
        k = jnp.dot(b_b, wk_ref[li], preferred_element_type=jnp.float32)
        v = jnp.dot(b_b, wv_ref[li], preferred_element_type=jnp.float32)
        # Contract last dims of q and k directly: no explicit k.T transpose.
        s = jax.lax.dot_general(
            q.astype(jnp.bfloat16), k.astype(jnp.bfloat16),
            dimension_numbers=(((1,), (1,)), ((), ())),
            preferred_element_type=jnp.float32) * scale          # (L, L)
        m = jnp.max(s, axis=-1, keepdims=True)
        p = jnp.exp(s - m)
        inv = pl.reciprocal(jnp.sum(p, axis=-1, keepdims=True), approx=True)
        p = p * inv
        attn = jnp.dot(p.astype(jnp.bfloat16), v.astype(jnp.bfloat16),
                       preferred_element_type=jnp.float32)       # (L, Dp)
        return a + jnp.dot(attn.astype(jnp.bfloat16), wo_ref[li],
                           preferred_element_type=jnp.float32)

    def conv(x, li):
        """Conv1d(D, D, kernel_size=3, padding=1) along the sequence axis."""
        x_prev = pltpu.roll(x, shift=1, axis=0) * m_prev         # x[l-1]
        x_next = pltpu.roll(x, shift=L - 1, axis=0) * m_next     # x[l+1]
        acc = jnp.dot(x_prev.astype(jnp.bfloat16), cw_ref[li, 0],
                      preferred_element_type=jnp.float32)
        acc = acc + jnp.dot(x.astype(jnp.bfloat16), cw_ref[li, 1],
                            preferred_element_type=jnp.float32)
        acc = acc + jnp.dot(x_next.astype(jnp.bfloat16), cw_ref[li, 2],
                            preferred_element_type=jnp.float32)
        return acc + cb_ref[li]                                  # (1, Dp) bias

    # Static unroll over the (small) numcross iterations.
    for it in range(numcross):
        y1 = cross(y, z, 2 * it)
        z1 = cross(z, y, 2 * it + 1)
        if it < numconv1:
            y1 = conv(y1, 2 * it)
            z1 = conv(z1, 2 * it + 1)
        y, z = y1, z1

    yo_ref[0] = y.astype(yo_ref.dtype)
    zo_ref[0] = z.astype(zo_ref.dtype)


# ------------------------------ JAX wrapper ----------------------------------

def cross_block_forward(params, y, z, *, numcross=3, numconv1=2):
    """Mirrors CrossBlock.forward: per iteration, two cross layers and
    (for the first `numconv1` iterations) two conv1d layers."""
    B, L, D = y.shape
    Dp = params["wq"].shape[-1]
    pad = Dp - D
    yp = jnp.pad(y, ((0, 0), (0, 0), (0, pad))) if pad else y
    zp = jnp.pad(z, ((0, 0), (0, 0), (0, pad))) if pad else z

    kernel = functools.partial(
        _cross_block_kernel,
        numcross=numcross, numconv1=numconv1,
        scale=1.0 / math.sqrt(D), seq_len=L)

    io_spec = pl.BlockSpec((1, L, Dp), lambda b: (b, 0, 0))
    w_spec = pl.BlockSpec((2 * numcross, Dp, Dp), lambda b: (0, 0, 0))
    cw_spec = pl.BlockSpec((2 * numconv1, 3, Dp, Dp), lambda b: (0, 0, 0, 0))
    cb_spec = pl.BlockSpec((2 * numconv1, 1, Dp), lambda b: (0, 0, 0))

    y_out, z_out = pl.pallas_call(
        kernel,
        out_shape=(jax.ShapeDtypeStruct((B, L, Dp), jnp.float32),
                   jax.ShapeDtypeStruct((B, L, Dp), jnp.float32)),
        grid=(B,),
        in_specs=[io_spec, io_spec, w_spec, w_spec, w_spec, w_spec,
                  cw_spec, cb_spec],
        out_specs=(io_spec, io_spec),
        compiler_params=pltpu.CompilerParams(
            dimension_semantics=("parallel",),
            vmem_limit_bytes=32 * 1024 * 1024),
    )(yp, zp, params["wq"], params["wk"], params["wv"], params["wo"],
      params["cw"], params["cb"])

    return y_out[..., :D], z_out[..., :D]


# --------------------------- parameter construction --------------------------

def init_cross_block_params(key, d_model, *, numcross=3, numconv1=2,
                            lane_pad=128):
    if numcross < numconv1 + 1:
        raise ValueError("numcross should be greater than numconv1 + 1")
    Dp = max(lane_pad, ((d_model + 127) // 128) * 128)
    pd = Dp - d_model
    nc = 2 * numcross            # two cross layers per iteration
    nv = 2 * numconv1            # two conv1d layers per conv-iteration
    scale = 1.0 / math.sqrt(d_model)

    keys = jax.random.split(key, 6)
    wq = scale * jax.random.normal(keys[0], (nc, d_model, d_model), jnp.float32)
    wk = scale * jax.random.normal(keys[1], (nc, d_model, d_model), jnp.float32)
    wv = scale * jax.random.normal(keys[2], (nc, d_model, d_model), jnp.float32)
    wo = scale * jax.random.normal(keys[3], (nc, d_model, d_model), jnp.float32)
    cw = scale * jax.random.normal(keys[4], (nv, 3, d_model, d_model),
                                   jnp.float32)
    cb = 0.01 * jax.random.normal(keys[5], (nv, 1, d_model), jnp.float32)

    pad3 = ((0, 0), (0, pd), (0, pd))
    return {
        # Zero-padded to a 128-wide lane dim and pre-cast to bf16 (MXU inputs).
        "wq": jnp.pad(wq, pad3).astype(jnp.bfloat16),
        "wk": jnp.pad(wk, pad3).astype(jnp.bfloat16),
        "wv": jnp.pad(wv, pad3).astype(jnp.bfloat16),
        "wo": jnp.pad(wo, pad3).astype(jnp.bfloat16),
        "cw": jnp.pad(cw, ((0, 0), (0, 0), (0, pd), (0, pd))).astype(jnp.bfloat16),
        "cb": jnp.pad(cb, ((0, 0), (0, 0), (0, pd))).astype(jnp.float32),
    }


# ---------------------------------- main --------------------------------------

if __name__ == "__main__":
    B, L, D = 2, 8, 32          # batch, seq, hidden
    key = jax.random.PRNGKey(0)
    ky, kz, kp = jax.random.split(key, 3)
    y = jax.random.normal(ky, (B, L, D), jnp.float32)
    z = jax.random.normal(kz, (B, L, D), jnp.float32)

    params = init_cross_block_params(kp, D, numcross=3, numconv1=2)

    fwd = jax.jit(functools.partial(cross_block_forward,
                                    numcross=3, numconv1=2))
    y_out, z_out = fwd(params, y, z)
    jax.block_until_ready((y_out, z_out))

    assert y_out.shape == (B, L, D) and z_out.shape == (B, L, D)
    assert bool(jnp.all(jnp.isfinite(y_out))) and bool(jnp.all(jnp.isfinite(z_out)))
    print("KERNEL_OK")
</pallas_src>

<mosaic_0001>
module attributes {stable_mosaic.version = 11 : i64} {
  func.func @_cross_block_kernel(%arg0: i32, %arg1: memref<1x8x128xf32, #tpu.memory_space<vmem>>, %arg2: memref<1x8x128xf32, #tpu.memory_space<vmem>>, %arg3: memref<6x128x128xbf16, #tpu.memory_space<vmem>>, %arg4: memref<6x128x128xbf16, #tpu.memory_space<vmem>>, %arg5: memref<6x128x128xbf16, #tpu.memory_space<vmem>>, %arg6: memref<6x128x128xbf16, #tpu.memory_space<vmem>>, %arg7: memref<4x3x128x128xbf16, #tpu.memory_space<vmem>>, %arg8: memref<4x1x128xf32, #tpu.memory_space<vmem>>, %arg9: memref<1x8x128xf32, #tpu.memory_space<vmem>>, %arg10: memref<1x8x128xf32, #tpu.memory_space<vmem>>) attributes {dimension_semantics = [#tpu.dimension_semantics<parallel>], iteration_bounds = array<i64: 2>, scalar_prefetch = 0 : i64, scratch_operands = 0 : i64, tpu.core_type = #tpu.core_type<tc>, window_params = [{transform_indices = @transform_0, window_bounds = array<i64: 1, 8, 128>}, {transform_indices = @transform_1, window_bounds = array<i64: 1, 8, 128>}, {pipeline_mode = #tpu.pipeline_mode<synchronous>, transform_indices = @transform_2, window_bounds = array<i64: 6, 128, 128>}, {pipeline_mode = #tpu.pipeline_mode<synchronous>, transform_indices = @transform_3, window_bounds = array<i64: 6, 128, 128>}, {pipeline_mode = #tpu.pipeline_mode<synchronous>, transform_indices = @transform_4, window_bounds = array<i64: 6, 128, 128>}, {pipeline_mode = #tpu.pipeline_mode<synchronous>, transform_indices = @transform_5, window_bounds = array<i64: 6, 128, 128>}, {pipeline_mode = #tpu.pipeline_mode<synchronous>, transform_indices = @transform_6, window_bounds = array<i64: 4, 3, 128, 128>}, {pipeline_mode = #tpu.pipeline_mode<synchronous>, transform_indices = @transform_7, window_bounds = array<i64: 4, 1, 128>}, {transform_indices = @transform_8, window_bounds = array<i64: 1, 8, 128>}, {transform_indices = @transform_9, window_bounds = array<i64: 1, 8, 128>}]} {
    %c0 = arith.constant 0 : index
    %c0_0 = arith.constant 0 : index
    %c0_1 = arith.constant 0 : index
    %0 = vector.load %arg1[%c0, %c0_0, %c0_1] : memref<1x8x128xf32, #tpu.memory_space<vmem>>, vector<1x8x128xf32>
    %1 = vector.shape_cast %0 : vector<1x8x128xf32> to vector<8x128xf32>
    %c0_2 = arith.constant 0 : index
    %c0_3 = arith.constant 0 : index
    %c0_4 = arith.constant 0 : index
    %2 = vector.load %arg2[%c0_2, %c0_3, %c0_4] : memref<1x8x128xf32, #tpu.memory_space<vmem>>, vector<1x8x128xf32>
    %3 = vector.shape_cast %2 : vector<1x8x128xf32> to vector<8x128xf32>
    %4 = tpu.iota {dimensions = array<i32: 0>} : vector<8x1xi32>
    %c0_i32 = arith.constant 0 : i32
    %5 = vector.broadcast %c0_i32 : i32 to vector<8x1xi32>
    %6 = arith.cmpi sgt, %4, %5 : vector<8x1xi32>
    %7 = arith.extui %6 : vector<8x1xi1> to vector<8x1xi32>
    %8 = arith.sitofp %7 : vector<8x1xi32> to vector<8x1xf32>
    %c7_i32 = arith.constant 7 : i32
    %9 = vector.broadcast %c7_i32 : i32 to vector<8x1xi32>
    %10 = arith.cmpi slt, %4, %9 : vector<8x1xi32>
    %11 = arith.extui %10 : vector<8x1xi1> to vector<8x1xi32>
    %12 = arith.sitofp %11 : vector<8x1xi32> to vector<8x1xf32>
    %13 = arith.truncf %1 : vector<8x128xf32> to vector<8x128xbf16>
    %14 = arith.truncf %3 : vector<8x128xf32> to vector<8x128xbf16>
    %c0_5 = arith.constant 0 : index
    %c0_6 = arith.constant 0 : index
    %c0_7 = arith.constant 0 : index
    %15 = vector.load %arg3[%c0_5, %c0_6, %c0_7] : memref<6x128x128xbf16, #tpu.memory_space<vmem>>, vector<1x128x128xbf16>
    %16 = vector.shape_cast %15 : vector<1x128x128xbf16> to vector<128x128xbf16>
    %cst = arith.constant dense<0.000000e+00> : vector<8x128xf32>
    %17 = tpu.matmul %13, %16, %cst {dimension_numbers = #tpu.dot_dimension_numbers<[1], [0], [0], [1], [0, 0, 1, 1], [], []>} : vector<8x128xbf16>, vector<128x128xbf16>, vector<8x128xf32> -> vector<8x128xf32>
    %c0_8 = arith.constant 0 : index
    %c0_9 = arith.constant 0 : index
    %c0_10 = arith.constant 0 : index
    %18 = vector.load %arg4[%c0_8, %c0_9, %c0_10] : memref<6x128x128xbf16, #tpu.memory_space<vmem>>, vector<1x128x128xbf16>
    %19 = vector.shape_cast %18 : vector<1x128x128xbf16> to vector<128x128xbf16>
    %cst_11 = arith.constant dense<0.000000e+00> : vector<8x128xf32>
    %20 = tpu.matmul %14, %19, %cst_11 {dimension_numbers = #tpu.dot_dimension_numbers<[1], [0], [0], [1], [0, 0, 1, 1], [], []>} : vector<8x128xbf16>, vector<128x128xbf16>, vector<8x128xf32> -> vector<8x128xf32>
    %c0_12 = arith.constant 0 : index
    %c0_13 = arith.constant 0 : index
    %c0_14 = arith.constant 0 : index
    %21 = vector.load %arg5[%c0_12, %c0_13, %c0_14] : memref<6x128x128xbf16, #tpu.memory_space<vmem>>, vector<1x128x128xbf16>
    %22 = vector.shape_cast %21 : vector<1x128x128xbf16> to vector<128x128xbf16>
    %cst_15 = arith.constant dense<0.000000e+00> : vector<8x128xf32>
    %23 = tpu.matmul %14, %22, %cst_15 {dimension_numbers = #tpu.dot_dimension_numbers<[1], [0], [0], [1], [0, 0, 1, 1], [], []>} : vector<8x128xbf16>, vector<128x128xbf16>, vector<8x128xf32> -> vector<8x128xf32>
    %24 = arith.truncf %17 : vector<8x128xf32> to vector<8x128xbf16>
    %25 = arith.truncf %20 : vector<8x128xf32> to vector<8x128xbf16>
    %cst_16 = arith.constant dense<0.000000e+00> : vector<8x8xf32>
    %26 = tpu.matmul %24, %25, %cst_16 {dimension_numbers = #tpu.dot_dimension_numbers<[1], [1], [0], [0], [0, 0, 1, 0], [], []>} : vector<8x128xbf16>, vector<8x128xbf16>, vector<8x8xf32> -> vector<8x8xf32>
    %cst_17 = arith.constant 0.176776692 : f32
    %27 = vector.broadcast %cst_17 : f32 to vector<8x8xf32>
    %28 = arith.mulf %26, %27 : vector<8x8xf32>
    %cst_18 = arith.constant dense<0xFF800000> : vector<8xf32>
    %29 = vector.multi_reduction <maximumf>, %28, %cst_18 [1] : vector<8x8xf32> to vector<8xf32>
    %30 = vector.shape_cast %29 : vector<8xf32> to vector<8x1xf32>
    %31 = vector.broadcast %30 : vector<8x1xf32> to vector<8x8xf32>
    %32 = arith.subf %28, %31 : vector<8x8xf32>
    %33 = math.exp %32 : vector<8x8xf32>
    %cst_19 = arith.constant dense<0.000000e+00> : vector<8xf32>
    %34 = vector.multi_reduction <add>, %33, %cst_19 [1] : vector<8x8xf32> to vector<8xf32>
    %35 = vector.shape_cast %34 : vector<8xf32> to vector<8x1xf32>
    %36 = tpu.reciprocal %35 {approx = true} : vector<8x1xf32> -> vector<8x1xf32>
    %37 = vector.broadcast %36 : vector<8x1xf32> to vector<8x8xf32>
    %38 = arith.mulf %33, %37 : vector<8x8xf32>
    %39 = arith.truncf %38 : vector<8x8xf32> to vector<8x8xbf16>
    %40 = arith.truncf %23 : vector<8x128xf32> to vector<8x128xbf16>
    %cst_20 = arith.constant dense<0.000000e+00> : vector<8x128xf32>
    %41 = tpu.matmul %39, %40, %cst_20 {dimension_numbers = #tpu.dot_dimension_numbers<[1], [0], [0], [1], [0, 0, 1, 1], [], []>} : vector<8x8xbf16>, vector<8x128xbf16>, vector<8x128xf32> -> vector<8x128xf32>
    %42 = arith.truncf %41 : vector<8x128xf32> to vector<8x128xbf16>
    %c0_21 = arith.constant 0 : index
    %c0_22 = arith.constant 0 : index
    %c0_23 = arith.constant 0 : index
    %43 = vector.load %arg6[%c0_21, %c0_22, %c0_23] : memref<6x128x128xbf16, #tpu.memory_space<vmem>>, vector<1x128x128xbf16>
    %44 = vector.shape_cast %43 : vector<1x128x128xbf16> to vector<128x128xbf16>
    %cst_24 = arith.constant dense<0.000000e+00> : vector<8x128xf32>
    %45 = tpu.matmul %42, %44, %cst_24 {dimension_numbers = #tpu.dot_dimension_numbers<[1], [0], [0], [1], [0, 0, 1, 1], [], []>} : vector<8x128xbf16>, vector<128x128xbf16>, vector<8x128xf32> -> vector<8x128xf32>
    %46 = arith.addf %1, %45 : vector<8x128xf32>
    %47 = arith.truncf %3 : vector<8x128xf32> to vector<8x128xbf16>
    %48 = arith.truncf %1 : vector<8x128xf32> to vector<8x128xbf16>
    %c1 = arith.constant 1 : index
    %c0_25 = arith.constant 0 : index
    %c0_26 = arith.constant 0 : index
    %49 = vector.load %arg3[%c1, %c0_25, %c0_26] : memref<6x128x128xbf16, #tpu.memory_space<vmem>>, vector<1x128x128xbf16>
    %50 = vector.shape_cast %49 : vector<1x128x128xbf16> to vector<128x128xbf16>
    %cst_27 = arith.constant dense<0.000000e+00> : vector<8x128xf32>
    %51 = tpu.matmul %47, %50, %cst_27 {dimension_numbers = #tpu.dot_dimension_numbers<[1], [0], [0], [1], [0, 0, 1, 1], [], []>} : vector<8x128xbf16>, vector<128x128xbf16>, vector<8x128xf32> -> vector<8x128xf32>
    %c1_28 = arith.constant 1 : index
    %c0_29 = arith.constant 0 : index
    %c0_30 = arith.constant 0 : index
    %52 = vector.load %arg4[%c1_28, %c0_29, %c0_30] : memref<6x128x128xbf16, #tpu.memory_space<vmem>>, vector<1x128x128xbf16>
    %53 = vector.shape_cast %52 : vector<1x128x128xbf16> to vector<128x128xbf16>
    %cst_31 = arith.constant dense<0.000000e+00> : vector<8x128xf32>
    %54 = tpu.matmul %48, %53, %cst_31 {dimension_numbers = #tpu.dot_dimension_numbers<[1], [0], [0], [1], [0, 0, 1, 1], [], []>} : vector<8x128xbf16>, vector<128x128xbf16>, vector<8x128xf32> -> vector<8x128xf32>
    %c1_32 = arith.constant 1 : index
    %c0_33 = arith.constant 0 : index
    %c0_34 = arith.constant 0 : index
    %55 = vector.load %arg5[%c1_32, %c0_33, %c0_34] : memref<6x128x128xbf16, #tpu.memory_space<vmem>>, vector<1x128x128xbf16>
    %56 = vector.shape_cast %55 : vector<1x128x128xbf16> to vector<128x128xbf16>
    %cst_35 = arith.constant dense<0.000000e+00> : vector<8x128xf32>
    %57 = tpu.matmul %48, %56, %cst_35 {dimension_numbers = #tpu.dot_dimension_numbers<[1], [0], [0], [1], [0, 0, 1, 1], [], []>} : vector<8x128xbf16>, vector<128x128xbf16>, vector<8x128xf32> -> vector<8x128xf32>
    %58 = arith.truncf %51 : vector<8x128xf32> to vector<8x128xbf16>
    %59 = arith.truncf %54 : vector<8x128xf32> to vector<8x128xbf16>
    %cst_36 = arith.constant dense<0.000000e+00> : vector<8x8xf32>
    %60 = tpu.matmul %58, %59, %cst_36 {dimension_numbers = #tpu.dot_dimension_numbers<[1], [1], [0], [0], [0, 0, 1, 0], [], []>} : vector<8x128xbf16>, vector<8x128xbf16>, vector<8x8xf32> -> vector<8x8xf32>
    %cst_37 = arith.constant 0.176776692 : f32
    %61 = vector.broadcast %cst_37 : f32 to vector<8x8xf32>
    %62 = arith.mulf %60, %61 : vector<8x8xf32>
    %cst_38 = arith.constant dense<0xFF800000> : vector<8xf32>
    %63 = vector.multi_reduction <maximumf>, %62, %cst_38 [1] : vector<8x8xf32> to vector<8xf32>
    %64 = vector.shape_cast %63 : vector<8xf32> to vector<8x1xf32>
    %65 = vector.broadcast %64 : vector<8x1xf32> to vector<8x8xf32>
    %66 = arith.subf %62, %65 : vector<8x8xf32>
    %67 = math.exp %66 : vector<8x8xf32>
    %cst_39 = arith.constant dense<0.000000e+00> : vector<8xf32>
    %68 = vector.multi_reduction <add>, %67, %cst_39 [1] : vector<8x8xf32> to vector<8xf32>
    %69 = vector.shape_cast %68 : vector<8xf32> to vector<8x1xf32>
    %70 = tpu.reciprocal %69 {approx = true} : vector<8x1xf32> -> vector<8x1xf32>
    %71 = vector.broadcast %70 : vector<8x1xf32> to vector<8x8xf32>
    %72 = arith.mulf %67, %71 : vector<8x8xf32>
    %73 = arith.truncf %72 : vector<8x8xf32> to vector<8x8xbf16>
    %74 = arith.truncf %57 : vector<8x128xf32> to vector<8x128xbf16>
    %cst_40 = arith.constant dense<0.000000e+00> : vector<8x128xf32>
    %75 = tpu.matmul %73, %74, %cst_40 {dimension_numbers = #tpu.dot_dimension_numbers<[1], [0], [0], [1], [0, 0, 1, 1], [], []>} : vector<8x8xbf16>, vector<8x128xbf16>, vector<8x128xf32> -> vector<8x128xf32>
    %76 = arith.truncf %75 : vector<8x128xf32> to vector<8x128xbf16>
    %c1_41 = arith.constant 1 : index
    %c0_42 = arith.constant 0 : index
    %c0_43 = arith.constant 0 : index
    %77 = vector.load %arg6[%c1_41, %c0_42, %c0_43] : memref<6x128x128xbf16, #tpu.memory_space<vmem>>, vector<1x128x128xbf16>
    %78 = vector.shape_cast %77 : vector<1x128x128xbf16> to vector<128x128xbf16>
    %cst_44 = arith.constant dense<0.000000e+00> : vector<8x128xf32>
    %79 = tpu.matmul %76, %78, %cst_44 {dimension_numbers = #tpu.dot_dimension_numbers<[1], [0], [0], [1], [0, 0, 1, 1], [], []>} : vector<8x128xbf16>, vector<128x128xbf16>, vector<8x128xf32> -> vector<8x128xf32>
    %80 = arith.addf %3, %79 : vector<8x128xf32>
    %c1_i32 = arith.constant 1 : i32
    %81 = tpu.dynamic_rotate %46 by %c1_i32 dim 0 : vector<8x128xf32>, i32 -> vector<8x128xf32>
    %82 = vector.broadcast %8 : vector<8x1xf32> to vector<8x128xf32>
    %83 = arith.mulf %81, %82 : vector<8x128xf32>
    %c7_i32_45 = arith.constant 7 : i32
    %84 = tpu.dynamic_rotate %46 by %c7_i32_45 dim 0 : vector<8x128xf32>, i32 -> vector<8x128xf32>
    %85 = vector.broadcast %12 : vector<8x1xf32> to vector<8x128xf32>
    %86 = arith.mulf %84, %85 : vector<8x128xf32>
    %87 = arith.truncf %83 : vector<8x128xf32> to vector<8x128xbf16>
    %c0_46 = arith.constant 0 : index
    %c0_47 = arith.constant 0 : index
    %c0_48 = arith.constant 0 : index
    %c0_49 = arith.constant 0 : index
    %88 = vector.load %arg7[%c0_46, %c0_47, %c0_48, %c0_49] : memref<4x3x128x128xbf16, #tpu.memory_space<vmem>>, vector<1x1x128x128xbf16>
    %89 = vector.shape_cast %88 : vector<1x1x128x128xbf16> to vector<128x128xbf16>
    %cst_50 = arith.constant dense<0.000000e+00> : vector<8x128xf32>
    %90 = tpu.matmul %87, %89, %cst_50 {dimension_numbers = #tpu.dot_dimension_numbers<[1], [0], [0], [1], [0, 0, 1, 1], [], []>} : vector<8x128xbf16>, vector<128x128xbf16>, vector<8x128xf32> -> vector<8x128xf32>
    %91 = arith.truncf %46 : vector<8x128xf32> to vector<8x128xbf16>
    %c0_51 = arith.constant 0 : index
    %c1_52 = arith.constant 1 : index
    %c0_53 = arith.constant 0 : index
    %c0_54 = arith.constant 0 : index
    %92 = vector.load %arg7[%c0_51, %c1_52, %c0_53, %c0_54] : memref<4x3x128x128xbf16, #tpu.memory_space<vmem>>, vector<1x1x128x128xbf16>
    %93 = vector.shape_cast %92 : vector<1x1x128x128xbf16> to vector<128x128xbf16>
    %cst_55 = arith.constant dense<0.000000e+00> : vector<8x128xf32>
    %94 = tpu.matmul %91, %93, %cst_55 {dimension_numbers = #tpu.dot_dimension_numbers<[1], [0], [0], [1], [0, 0, 1, 1], [], []>} : vector<8x128xbf16>, vector<128x128xbf16>, vector<8x128xf32> -> vector<8x128xf32>
    %95 = arith.addf %90, %94 : vector<8x128xf32>
    %96 = arith.truncf %86 : vector<8x128xf32> to vector<8x128xbf16>
    %c0_56 = arith.constant 0 : index
    %c2 = arith.constant 2 : index
    %c0_57 = arith.constant 0 : index
    %c0_58 = arith.constant 0 : index
    %97 = vector.load %arg7[%c0_56, %c2, %c0_57, %c0_58] : memref<4x3x128x128xbf16, #tpu.memory_space<vmem>>, vector<1x1x128x128xbf16>
    %98 = vector.shape_cast %97 : vector<1x1x128x128xbf16> to vector<128x128xbf16>
    %cst_59 = arith.constant dense<0.000000e+00> : vector<8x128xf32>
    %99 = tpu.matmul %96, %98, %cst_59 {dimension_numbers = #tpu.dot_dimension_numbers<[1], [0], [0], [1], [0, 0, 1, 1], [], []>} : vector<8x128xbf16>, vector<128x128xbf16>, vector<8x128xf32> -> vector<8x128xf32>
    %100 = arith.addf %95, %99 : vector<8x128xf32>
    %c0_60 = arith.constant 0 : index
    %c0_61 = arith.constant 0 : index
    %c0_62 = arith.constant 0 : index
    %101 = vector.load %arg8[%c0_60, %c0_61, %c0_62] : memref<4x1x128xf32, #tpu.memory_space<vmem>>, vector<1x1x128xf32>
    %102 = vector.shape_cast %101 : vector<1x1x128xf32> to vector<1x128xf32>
    %103 = vector.broadcast %102 : vector<1x128xf32> to vector<8x128xf32>
    %104 = arith.addf %100, %103 : vector<8x128xf32>
    %c1_i32_63 = arith.constant 1 : i32
    %105 = tpu.dynamic_rotate %80 by %c1_i32_63 dim 0 : vector<8x128xf32>, i32 -> vector<8x128xf32>
    %106 = vector.broadcast %8 : vector<8x1xf32> to vector<8x128xf32>
    %107 = arith.mulf %105, %106 : vector<8x128xf32>
    %c7_i32_64 = arith.constant 7 : i32
    %108 = tpu.dynamic_rotate %80 by %c7_i32_64 dim 0 : vector<8x128xf32>, i32 -> vector<8x128xf32>
    %109 = vector.broadcast %12 : vector<8x1xf32> to vector<8x128xf32>
    %110 = arith.mulf %108, %109 : vector<8x128xf32>
    %111 = arith.truncf %107 : vector<8x128xf32> to vector<8x128xbf16>
    %c1_65 = arith.constant 1 : index
    %c0_66 = arith.constant 0 : index
    %c0_67 = arith.constant 0 : index
    %c0_68 = arith.constant 0 : index
    %112 = vector.load %arg7[%c1_65, %c0_66, %c0_67, %c0_68] : memref<4x3x128x128xbf16, #tpu.memory_space<vmem>>, vector<1x1x128x128xbf16>
    %113 = vector.shape_cast %112 : vector<1x1x128x128xbf16> to vector<128x128xbf16>
    %cst_69 = arith.constant dense<0.000000e+00> : vector<8x128xf32>
    %114 = tpu.matmul %111, %113, %cst_69 {dimension_numbers = #tpu.dot_dimension_numbers<[1], [0], [0], [1], [0, 0, 1, 1], [], []>} : vector<8x128xbf16>, vector<128x128xbf16>, vector<8x128xf32> -> vector<8x128xf32>
    %115 = arith.truncf %80 : vector<8x128xf32> to vector<8x128xbf16>
    %c1_70 = arith.constant 1 : index
    %c1_71 = arith.constant 1 : index
    %c0_72 = arith.constant 0 : index
    %c0_73 = arith.constant 0 : index
    %116 = vector.load %arg7[%c1_70, %c1_71, %c0_72, %c0_73] : memref<4x3x128x128xbf16, #tpu.memory_space<vmem>>, vector<1x1x128x128xbf16>
    %117 = vector.shape_cast %116 : vector<1x1x128x128xbf16> to vector<128x128xbf16>
    %cst_74 = arith.constant dense<0.000000e+00> : vector<8x128xf32>
    %118 = tpu.matmul %115, %117, %cst_74 {dimension_numbers = #tpu.dot_dimension_numbers<[1], [0], [0], [1], [0, 0, 1, 1], [], []>} : vector<8x128xbf16>, vector<128x128xbf16>, vector<8x128xf32> -> vector<8x128xf32>
    %119 = arith.addf %114, %118 : vector<8x128xf32>
    %120 = arith.truncf %110 : vector<8x128xf32> to vector<8x128xbf16>
    %c1_75 = arith.constant 1 : index
    %c2_76 = arith.constant 2 : index
    %c0_77 = arith.constant 0 : index
    %c0_78 = arith.constant 0 : index
    %121 = vector.load %arg7[%c1_75, %c2_76, %c0_77, %c0_78] : memref<4x3x128x128xbf16, #tpu.memory_space<vmem>>, vector<1x1x128x128xbf16>
    %122 = vector.shape_cast %121 : vector<1x1x128x128xbf16> to vector<128x128xbf16>
    %cst_79 = arith.constant dense<0.000000e+00> : vector<8x128xf32>
    %123 = tpu.matmul %120, %122, %cst_79 {dimension_numbers = #tpu.dot_dimension_numbers<[1], [0], [0], [1], [0, 0, 1, 1], [], []>} : vector<8x128xbf16>, vector<128x128xbf16>, vector<8x128xf32> -> vector<8x128xf32>
    %124 = arith.addf %119, %123 : vector<8x128xf32>
    %c1_80 = arith.constant 1 : index
    %c0_81 = arith.constant 0 : index
    %c0_82 = arith.constant 0 : index
    %125 = vector.load %arg8[%c1_80, %c0_81, %c0_82] : memref<4x1x128xf32, #tpu.memory_space<vmem>>, vector<1x1x128xf32>
    %126 = vector.shape_cast %125 : vector<1x1x128xf32> to vector<1x128xf32>
    %127 = vector.broadcast %126 : vector<1x128xf32> to vector<8x128xf32>
    %128 = arith.addf %124, %127 : vector<8x128xf32>
    %129 = arith.truncf %104 : vector<8x128xf32> to vector<8x128xbf16>
    %130 = arith.truncf %128 : vector<8x128xf32> to vector<8x128xbf16>
    %c2_83 = arith.constant 2 : index
    %c0_84 = arith.constant 0 : index
    %c0_85 = arith.constant 0 : index
    %131 = vector.load %arg3[%c2_83, %c0_84, %c0_85] : memref<6x128x128xbf16, #tpu.memory_space<vmem>>, vector<1x128x128xbf16>
    %132 = vector.shape_cast %131 : vector<1x128x128xbf16> to vector<128x128xbf16>
    %cst_86 = arith.constant dense<0.000000e+00> : vector<8x128xf32>
    %133 = tpu.matmul %129, %132, %cst_86 {dimension_numbers = #tpu.dot_dimension_numbers<[1], [0], [0], [1], [0, 0, 1, 1], [], []>} : vector<8x128xbf16>, vector<128x128xbf16>, vector<8x128xf32> -> vector<8x128xf32>
    %c2_87 = arith.constant 2 : index
    %c0_88 = arith.constant 0 : index
    %c0_89 = arith.constant 0 : index
    %134 = vector.load %arg4[%c2_87, %c0_88, %c0_89] : memref<6x128x128xbf16, #tpu.memory_space<vmem>>, vector<1x128x128xbf16>
    %135 = vector.shape_cast %134 : vector<1x128x128xbf16> to vector<128x128xbf16>
    %cst_90 = arith.constant dense<0.000000e+00> : vector<8x128xf32>
    %136 = tpu.matmul %130, %135, %cst_90 {dimension_numbers = #tpu.dot_dimension_numbers<[1], [0], [0], [1], [0, 0, 1, 1], [], []>} : vector<8x128xbf16>, vector<128x128xbf16>, vector<8x128xf32> -> vector<8x128xf32>
    %c2_91 = arith.constant 2 : index
    %c0_92 = arith.constant 0 : index
    %c0_93 = arith.constant 0 : index
    %137 = vector.load %arg5[%c2_91, %c0_92, %c0_93] : memref<6x128x128xbf16, #tpu.memory_space<vmem>>, vector<1x128x128xbf16>
    %138 = vector.shape_cast %137 : vector<1x128x128xbf16> to vector<128x128xbf16>
    %cst_94 = arith.constant dense<0.000000e+00> : vector<8x128xf32>
    %139 = tpu.matmul %130, %138, %cst_94 {dimension_numbers = #tpu.dot_dimension_numbers<[1], [0], [0], [1], [0, 0, 1, 1], [], []>} : vector<8x128xbf16>, vector<128x128xbf16>, vector<8x128xf32> -> vector<8x128xf32>
    %140 = arith.truncf %133 : vector<8x128xf32> to vector<8x128xbf16>
    %141 = arith.truncf %136 : vector<8x128xf32> to vector<8x128xbf16>
    %cst_95 = arith.constant dense<0.000000e+00> : vector<8x8xf32>
    %142 = tpu.matmul %140, %141, %cst_95 {dimension_numbers = #tpu.dot_dimension_numbers<[1], [1], [0], [0], [0, 0, 1, 0], [], []>} : vector<8x128xbf16>, vector<8x128xbf16>, vector<8x8xf32> -> vector<8x8xf32>
    %cst_96 = arith.constant 0.176776692 : f32
    %143 = vector.broadcast %cst_96 : f32 to vector<8x8xf32>
    %144 = arith.mulf %142, %143 : vector<8x8xf32>
    %cst_97 = arith.constant dense<0xFF800000> : vector<8xf32>
    %145 = vector.multi_reduction <maximumf>, %144, %cst_97 [1] : vector<8x8xf32> to vector<8xf32>
    %146 = vector.shape_cast %145 : vector<8xf32> to vector<8x1xf32>
    %147 = vector.broadcast %146 : vector<8x1xf32> to vector<8x8xf32>
    %148 = arith.subf %144, %147 : vector<8x8xf32>
    %149 = math.exp %148 : vector<8x8xf32>
    %cst_98 = arith.constant dense<0.000000e+00> : vector<8xf32>
    %150 = vector.multi_reduction <add>, %149, %cst_98 [1] : vector<8x8xf32> to vector<8xf32>
    %151 = vector.shape_cast %150 : vector<8xf32> to vector<8x1xf32>
    %152 = tpu.reciprocal %151 {approx = true} : vector<8x1xf32> -> vector<8x1xf32>
    %153 = vector.broadcast %152 : vector<8x1xf32> to vector<8x8xf32>
    %154 = arith.mulf %149, %153 : vector<8x8xf32>
    %155 = arith.truncf %154 : vector<8x8xf32> to vector<8x8xbf16>
    %156 = arith.truncf %139 : vector<8x128xf32> to vector<8x128xbf16>
    %cst_99 = arith.constant dense<0.000000e+00> : vector<8x128xf32>
    %157 = tpu.matmul %155, %156, %cst_99 {dimension_numbers = #tpu.dot_dimension_numbers<[1], [0], [0], [1], [0, 0, 1, 1], [], []>} : vector<8x8xbf16>, vector<8x128xbf16>, vector<8x128xf32> -> vector<8x128xf32>
    %158 = arith.truncf %157 : vector<8x128xf32> to vector<8x128xbf16>
    %c2_100 = arith.constant 2 : index
    %c0_101 = arith.constant 0 : index
    %c0_102 = arith.constant 0 : index
    %159 = vector.load %arg6[%c2_100, %c0_101, %c0_102] : memref<6x128x128xbf16, #tpu.memory_space<vmem>>, vector<1x128x128xbf16>
    %160 = vector.shape_cast %159 : vector<1x128x128xbf16> to vector<128x128xbf16>
    %cst_103 = arith.constant dense<0.000000e+00> : vector<8x128xf32>
    %161 = tpu.matmul %158, %160, %cst_103 {dimension_numbers = #tpu.dot_dimension_numbers<[1], [0], [0], [1], [0, 0, 1, 1], [], []>} : vector<8x128xbf16>, vector<128x128xbf16>, vector<8x128xf32> -> vector<8x128xf32>
    %162 = arith.addf %104, %161 : vector<8x128xf32>
    %163 = arith.truncf %128 : vector<8x128xf32> to vector<8x128xbf16>
    %164 = arith.truncf %104 : vector<8x128xf32> to vector<8x128xbf16>
    %c3 = arith.constant 3 : index
    %c0_104 = arith.constant 0 : index
    %c0_105 = arith.constant 0 : index
    %165 = vector.load %arg3[%c3, %c0_104, %c0_105] : memref<6x128x128xbf16, #tpu.memory_space<vmem>>, vector<1x128x128xbf16>
    %166 = vector.shape_cast %165 : vector<1x128x128xbf16> to vector<128x128xbf16>
    %cst_106 = arith.constant dense<0.000000e+00> : vector<8x128xf32>
    %167 = tpu.matmul %163, %166, %cst_106 {dimension_numbers = #tpu.dot_dimension_numbers<[1], [0], [0], [1], [0, 0, 1, 1], [], []>} : vector<8x128xbf16>, vector<128x128xbf16>, vector<8x128xf32> -> vector<8x128xf32>
    %c3_107 = arith.constant 3 : index
    %c0_108 = arith.constant 0 : index
    %c0_109 = arith.constant 0 : index
    %168 = vector.load %arg4[%c3_107, %c0_108, %c0_109] : memref<6x128x128xbf16, #tpu.memory_space<vmem>>, vector<1x128x128xbf16>
    %169 = vector.shape_cast %168 : vector<1x128x128xbf16> to vector<128x128xbf16>
    %cst_110 = arith.constant dense<0.000000e+00> : vector<8x128xf32>
    %170 = tpu.matmul %164, %169, %cst_110 {dimension_numbers = #tpu.dot_dimension_numbers<[1], [0], [0], [1], [0, 0, 1, 1], [], []>} : vector<8x128xbf16>, vector<128x128xbf16>, vector<8x128xf32> -> vector<8x128xf32>
    %c3_111 = arith.constant 3 : index
    %c0_112 = arith.constant 0 : index
    %c0_113 = arith.constant 0 : index
    %171 = vector.load %arg5[%c3_111, %c0_112, %c0_113] : memref<6x128x128xbf16, #tpu.memory_space<vmem>>, vector<1x128x128xbf16>
    %172 = vector.shape_cast %171 : vector<1x128x128xbf16> to vector<128x128xbf16>
    %cst_114 = arith.constant dense<0.000000e+00> : vector<8x128xf32>
    %173 = tpu.matmul %164, %172, %cst_114 {dimension_numbers = #tpu.dot_dimension_numbers<[1], [0], [0], [1], [0, 0, 1, 1], [], []>} : vector<8x128xbf16>, vector<128x128xbf16>, vector<8x128xf32> -> vector<8x128xf32>
    %174 = arith.truncf %167 : vector<8x128xf32> to vector<8x128xbf16>
    %175 = arith.truncf %170 : vector<8x128xf32> to vector<8x128xbf16>
    %cst_115 = arith.constant dense<0.000000e+00> : vector<8x8xf32>
    %176 = tpu.matmul %174, %175, %cst_115 {dimension_numbers = #tpu.dot_dimension_numbers<[1], [1], [0], [0], [0, 0, 1, 0], [], []>} : vector<8x128xbf16>, vector<8x128xbf16>, vector<8x8xf32> -> vector<8x8xf32>
    %cst_116 = arith.constant 0.176776692 : f32
    %177 = vector.broadcast %cst_116 : f32 to vector<8x8xf32>
    %178 = arith.mulf %176, %177 : vector<8x8xf32>
    %cst_117 = arith.constant dense<0xFF800000> : vector<8xf32>
    %179 = vector.multi_reduction <maximumf>, %178, %cst_117 [1] : vector<8x8xf32> to vector<8xf32>
    %180 = vector.shape_cast %179 : vector<8xf32> to vector<8x1xf32>
    %181 = vector.broadcast %180 : vector<8x1xf32> to vector<8x8xf32>
    %182 = arith.subf %178, %181 : vector<8x8xf32>
    %183 = math.exp %182 : vector<8x8xf32>
    %cst_118 = arith.constant dense<0.000000e+00> : vector<8xf32>
    %184 = vector.multi_reduction <add>, %183, %cst_118 [1] : vector<8x8xf32> to vector<8xf32>
    %185 = vector.shape_cast %184 : vector<8xf32> to vector<8x1xf32>
    %186 = tpu.reciprocal %185 {approx = true} : vector<8x1xf32> -> vector<8x1xf32>
    %187 = vector.broadcast %186 : vector<8x1xf32> to vector<8x8xf32>
    %188 = arith.mulf %183, %187 : vector<8x8xf32>
    %189 = arith.truncf %188 : vector<8x8xf32> to vector<8x8xbf16>
    %190 = arith.truncf %173 : vector<8x128xf32> to vector<8x128xbf16>
    %cst_119 = arith.constant dense<0.000000e+00> : vector<8x128xf32>
    %191 = tpu.matmul %189, %190, %cst_119 {dimension_numbers = #tpu.dot_dimension_numbers<[1], [0], [0], [1], [0, 0, 1, 1], [], []>} : vector<8x8xbf16>, vector<8x128xbf16>, vector<8x128xf32> -> vector<8x128xf32>
    %192 = arith.truncf %191 : vector<8x128xf32> to vector<8x128xbf16>
    %c3_120 = arith.constant 3 : index
    %c0_121 = arith.constant 0 : index
    %c0_122 = arith.constant 0 : index
    %193 = vector.load %arg6[%c3_120, %c0_121, %c0_122] : memref<6x128x128xbf16, #tpu.memory_space<vmem>>, vector<1x128x128xbf16>
    %194 = vector.shape_cast %193 : vector<1x128x128xbf16> to vector<128x128xbf16>
    %cst_123 = arith.constant dense<0.000000e+00> : vector<8x128xf32>
    %195 = tpu.matmul %192, %194, %cst_123 {dimension_numbers = #tpu.dot_dimension_numbers<[1], [0], [0], [1], [0, 0, 1, 1], [], []>} : vector<8x128xbf16>, vector<128x128xbf16>, vector<8x128xf32> -> vector<8x128xf32>
    %196 = arith.addf %128, %195 : vector<8x128xf32>
    %c1_i32_124 = arith.constant 1 : i32
    %197 = tpu.dynamic_rotate %162 by %c1_i32_124 dim 0 : vector<8x128xf32>, i32 -> vector<8x128xf32>
    %198 = vector.broadcast %8 : vector<8x1xf32> to vector<8x128xf32>
    %199 = arith.mulf %197, %198 : vector<8x128xf32>
    %c7_i32_125 = arith.constant 7 : i32
    %200 = tpu.dynamic_rotate %162 by %c7_i32_125 dim 0 : vector<8x128xf32>, i32 -> vector<8x128xf32>
    %201 = vector.broadcast %12 : vector<8x1xf32> to vector<8x128xf32>
    %202 = arith.mulf %200, %201 : vector<8x128xf32>
    %203 = arith.truncf %199 : vector<8x128xf32> to vector<8x128xbf16>
    %c2_126 = arith.constant 2 : index
    %c0_127 = arith.constant 0 : index
    %c0_128 = arith.constant 0 : index
    %c0_129 = arith.constant 0 : index
    %204 = vector.load %arg7[%c2_126, %c0_127, %c0_128, %c0_129] : memref<4x3x128x128xbf16, #tpu.memory_space<vmem>>, vector<1x1x128x128xbf16>
    %205 = vector.shape_cast %204 : vector<1x1x128x128xbf16> to vector<128x128xbf16>
    %cst_130 = arith.constant dense<0.000000e+00> : vector<8x128xf32>
    %206 = tpu.matmul %203, %205, %cst_130 {dimension_numbers = #tpu.dot_dimension_numbers<[1], [0], [0], [1], [0, 0, 1, 1], [], []>} : vector<8x128xbf16>, vector<128x128xbf16>, vector<8x128xf32> -> vector<8x128xf32>
    %207 = arith.truncf %162 : vector<8x128xf32> to vector<8x128xbf16>
    %c2_131 = arith.constant 2 : index
    %c1_132 = arith.constant 1 : index
    %c0_133 = arith.constant 0 : index
    %c0_134 = arith.constant 0 : index
    %208 = vector.load %arg7[%c2_131, %c1_132, %c0_133, %c0_134] : memref<4x3x128x128xbf16, #tpu.memory_space<vmem>>, vector<1x1x128x128xbf16>
    %209 = vector.shape_cast %208 : vector<1x1x128x128xbf16> to vector<128x128xbf16>
    %cst_135 = arith.constant dense<0.000000e+00> : vector<8x128xf32>
    %210 = tpu.matmul %207, %209, %cst_135 {dimension_numbers = #tpu.dot_dimension_numbers<[1], [0], [0], [1], [0, 0, 1, 1], [], []>} : vector<8x128xbf16>, vector<128x128xbf16>, vector<8x128xf32> -> vector<8x128xf32>
    %211 = arith.addf %206, %210 : vector<8x128xf32>
    %212 = arith.truncf %202 : vector<8x128xf32> to vector<8x128xbf16>
    %c2_136 = arith.constant 2 : index
    %c2_137 = arith.constant 2 : index
    %c0_138 = arith.constant 0 : index
    %c0_139 = arith.constant 0 : index
    %213 = vector.load %arg7[%c2_136, %c2_137, %c0_138, %c0_139] : memref<4x3x128x128xbf16, #tpu.memory_space<vmem>>, vector<1x1x128x128xbf16>
    %214 = vector.shape_cast %213 : vector<1x1x128x128xbf16> to vector<128x128xbf16>
    %cst_140 = arith.constant dense<0.000000e+00> : vector<8x128xf32>
    %215 = tpu.matmul %212, %214, %cst_140 {dimension_numbers = #tpu.dot_dimension_numbers<[1], [0], [0], [1], [0, 0, 1, 1], [], []>} : vector<8x128xbf16>, vector<128x128xbf16>, vector<8x128xf32> -> vector<8x128xf32>
    %216 = arith.addf %211, %215 : vector<8x128xf32>
    %c2_141 = arith.constant 2 : index
    %c0_142 = arith.constant 0 : index
    %c0_143 = arith.constant 0 : index
    %217 = vector.load %arg8[%c2_141, %c0_142, %c0_143] : memref<4x1x128xf32, #tpu.memory_space<vmem>>, vector<1x1x128xf32>
    %218 = vector.shape_cast %217 : vector<1x1x128xf32> to vector<1x128xf32>
    %219 = vector.broadcast %218 : vector<1x128xf32> to vector<8x128xf32>
    %220 = arith.addf %216, %219 : vector<8x128xf32>
    %c1_i32_144 = arith.constant 1 : i32
    %221 = tpu.dynamic_rotate %196 by %c1_i32_144 dim 0 : vector<8x128xf32>, i32 -> vector<8x128xf32>
    %222 = vector.broadcast %8 : vector<8x1xf32> to vector<8x128xf32>
    %223 = arith.mulf %221, %222 : vector<8x128xf32>
    %c7_i32_145 = arith.constant 7 : i32
    %224 = tpu.dynamic_rotate %196 by %c7_i32_145 dim 0 : vector<8x128xf32>, i32 -> vector<8x128xf32>
    %225 = vector.broadcast %12 : vector<8x1xf32> to vector<8x128xf32>
    %226 = arith.mulf %224, %225 : vector<8x128xf32>
    %227 = arith.truncf %223 : vector<8x128xf32> to vector<8x128xbf16>
    %c3_146 = arith.constant 3 : index
    %c0_147 = arith.constant 0 : index
    %c0_148 = arith.constant 0 : index
    %c0_149 = arith.constant 0 : index
    %228 = vector.load %arg7[%c3_146, %c0_147, %c0_148, %c0_149] : memref<4x3x128x128xbf16, #tpu.memory_space<vmem>>, vector<1x1x128x128xbf16>
    %229 = vector.shape_cast %228 : vector<1x1x128x128xbf16> to vector<128x128xbf16>
    %cst_150 = arith.constant dense<0.000000e+00> : vector<8x128xf32>
    %230 = tpu.matmul %227, %229, %cst_150 {dimension_numbers = #tpu.dot_dimension_numbers<[1], [0], [0], [1], [0, 0, 1, 1], [], []>} : vector<8x128xbf16>, vector<128x128xbf16>, vector<8x128xf32> -> vector<8x128xf32>
    %231 = arith.truncf %196 : vector<8x128xf32> to vector<8x128xbf16>
    %c3_151 = arith.constant 3 : index
    %c1_152 = arith.constant 1 : index
    %c0_153 = arith.constant 0 : index
    %c0_154 = arith.constant 0 : index
    %232 = vector.load %arg7[%c3_151, %c1_152, %c0_153, %c0_154] : memref<4x3x128x128xbf16, #tpu.memory_space<vmem>>, vector<1x1x128x128xbf16>
    %233 = vector.shape_cast %232 : vector<1x1x128x128xbf16> to vector<128x128xbf16>
    %cst_155 = arith.constant dense<0.000000e+00> : vector<8x128xf32>
    %234 = tpu.matmul %231, %233, %cst_155 {dimension_numbers = #tpu.dot_dimension_numbers<[1], [0], [0], [1], [0, 0, 1, 1], [], []>} : vector<8x128xbf16>, vector<128x128xbf16>, vector<8x128xf32> -> vector<8x128xf32>
    %235 = arith.addf %230, %234 : vector<8x128xf32>
    %236 = arith.truncf %226 : vector<8x128xf32> to vector<8x128xbf16>
    %c3_156 = arith.constant 3 : index
    %c2_157 = arith.constant 2 : index
    %c0_158 = arith.constant 0 : index
    %c0_159 = arith.constant 0 : index
    %237 = vector.load %arg7[%c3_156, %c2_157, %c0_158, %c0_159] : memref<4x3x128x128xbf16, #tpu.memory_space<vmem>>, vector<1x1x128x128xbf16>
    %238 = vector.shape_cast %237 : vector<1x1x128x128xbf16> to vector<128x128xbf16>
    %cst_160 = arith.constant dense<0.000000e+00> : vector<8x128xf32>
    %239 = tpu.matmul %236, %238, %cst_160 {dimension_numbers = #tpu.dot_dimension_numbers<[1], [0], [0], [1], [0, 0, 1, 1], [], []>} : vector<8x128xbf16>, vector<128x128xbf16>, vector<8x128xf32> -> vector<8x128xf32>
    %240 = arith.addf %235, %239 : vector<8x128xf32>
    %c3_161 = arith.constant 3 : index
    %c0_162 = arith.constant 0 : index
    %c0_163 = arith.constant 0 : index
    %241 = vector.load %arg8[%c3_161, %c0_162, %c0_163] : memref<4x1x128xf32, #tpu.memory_space<vmem>>, vector<1x1x128xf32>
    %242 = vector.shape_cast %241 : vector<1x1x128xf32> to vector<1x128xf32>
    %243 = vector.broadcast %242 : vector<1x128xf32> to vector<8x128xf32>
    %244 = arith.addf %240, %243 : vector<8x128xf32>
    %245 = arith.truncf %220 : vector<8x128xf32> to vector<8x128xbf16>
    %246 = arith.truncf %244 : vector<8x128xf32> to vector<8x128xbf16>
    %c4 = arith.constant 4 : index
    %c0_164 = arith.constant 0 : index
    %c0_165 = arith.constant 0 : index
    %247 = vector.load %arg3[%c4, %c0_164, %c0_165] : memref<6x128x128xbf16, #tpu.memory_space<vmem>>, vector<1x128x128xbf16>
    %248 = vector.shape_cast %247 : vector<1x128x128xbf16> to vector<128x128xbf16>
    %cst_166 = arith.constant dense<0.000000e+00> : vector<8x128xf32>
    %249 = tpu.matmul %245, %248, %cst_166 {dimension_numbers = #tpu.dot_dimension_numbers<[1], [0], [0], [1], [0, 0, 1, 1], [], []>} : vector<8x128xbf16>, vector<128x128xbf16>, vector<8x128xf32> -> vector<8x128xf32>
    %c4_167 = arith.constant 4 : index
    %c0_168 = arith.constant 0 : index
    %c0_169 = arith.constant 0 : index
    %250 = vector.load %arg4[%c4_167, %c0_168, %c0_169] : memref<6x128x128xbf16, #tpu.memory_space<vmem>>, vector<1x128x128xbf16>
    %251 = vector.shape_cast %250 : vector<1x128x128xbf16> to vector<128x128xbf16>
    %cst_170 = arith.constant dense<0.000000e+00> : vector<8x128xf32>
    %252 = tpu.matmul %246, %251, %cst_170 {dimension_numbers = #tpu.dot_dimension_numbers<[1], [0], [0], [1], [0, 0, 1, 1], [], []>} : vector<8x128xbf16>, vector<128x128xbf16>, vector<8x128xf32> -> vector<8x128xf32>
    %c4_171 = arith.constant 4 : index
    %c0_172 = arith.constant 0 : index
    %c0_173 = arith.constant 0 : index
    %253 = vector.load %arg5[%c4_171, %c0_172, %c0_173] : memref<6x128x128xbf16, #tpu.memory_space<vmem>>, vector<1x128x128xbf16>
    %254 = vector.shape_cast %253 : vector<1x128x128xbf16> to vector<128x128xbf16>
    %cst_174 = arith.constant dense<0.000000e+00> : vector<8x128xf32>
    %255 = tpu.matmul %246, %254, %cst_174 {dimension_numbers = #tpu.dot_dimension_numbers<[1], [0], [0], [1], [0, 0, 1, 1], [], []>} : vector<8x128xbf16>, vector<128x128xbf16>, vector<8x128xf32> -> vector<8x128xf32>
    %256 = arith.truncf %249 : vector<8x128xf32> to vector<8x128xbf16>
    %257 = arith.truncf %252 : vector<8x128xf32> to vector<8x128xbf16>
    %cst_175 = arith.constant dense<0.000000e+00> : vector<8x8xf32>
    %258 = tpu.matmul %256, %257, %cst_175 {dimension_numbers = #tpu.dot_dimension_numbers<[1], [1], [0], [0], [0, 0, 1, 0], [], []>} : vector<8x128xbf16>, vector<8x128xbf16>, vector<8x8xf32> -> vector<8x8xf32>
    %cst_176 = arith.constant 0.176776692 : f32
    %259 = vector.broadcast %cst_176 : f32 to vector<8x8xf32>
    %260 = arith.mulf %258, %259 : vector<8x8xf32>
    %cst_177 = arith.constant dense<0xFF800000> : vector<8xf32>
    %261 = vector.multi_reduction <maximumf>, %260, %cst_177 [1] : vector<8x8xf32> to vector<8xf32>
    %262 = vector.shape_cast %261 : vector<8xf32> to vector<8x1xf32>
    %263 = vector.broadcast %262 : vector<8x1xf32> to vector<8x8xf32>
    %264 = arith.subf %260, %263 : vector<8x8xf32>
    %265 = math.exp %264 : vector<8x8xf32>
    %cst_178 = arith.constant dense<0.000000e+00> : vector<8xf32>
    %266 = vector.multi_reduction <add>, %265, %cst_178 [1] : vector<8x8xf32> to vector<8xf32>
    %267 = vector.shape_cast %266 : vector<8xf32> to vector<8x1xf32>
    %268 = tpu.reciprocal %267 {approx = true} : vector<8x1xf32> -> vector<8x1xf32>
    %269 = vector.broadcast %268 : vector<8x1xf32> to vector<8x8xf32>
    %270 = arith.mulf %265, %269 : vector<8x8xf32>
    %271 = arith.truncf %270 : vector<8x8xf32> to vector<8x8xbf16>
    %272 = arith.truncf %255 : vector<8x128xf32> to vector<8x128xbf16>
    %cst_179 = arith.constant dense<0.000000e+00> : vector<8x128xf32>
    %273 = tpu.matmul %271, %272, %cst_179 {dimension_numbers = #tpu.dot_dimension_numbers<[1], [0], [0], [1], [0, 0, 1, 1], [], []>} : vector<8x8xbf16>, vector<8x128xbf16>, vector<8x128xf32> -> vector<8x128xf32>
    %274 = arith.truncf %273 : vector<8x128xf32> to vector<8x128xbf16>
    %c4_180 = arith.constant 4 : index
    %c0_181 = arith.constant 0 : index
    %c0_182 = arith.constant 0 : index
    %275 = vector.load %arg6[%c4_180, %c0_181, %c0_182] : memref<6x128x128xbf16, #tpu.memory_space<vmem>>, vector<1x128x128xbf16>
    %276 = vector.shape_cast %275 : vector<1x128x128xbf16> to vector<128x128xbf16>
    %cst_183 = arith.constant dense<0.000000e+00> : vector<8x128xf32>
    %277 = tpu.matmul %274, %276, %cst_183 {dimension_numbers = #tpu.dot_dimension_numbers<[1], [0], [0], [1], [0, 0, 1, 1], [], []>} : vector<8x128xbf16>, vector<128x128xbf16>, vector<8x128xf32> -> vector<8x128xf32>
    %278 = arith.addf %220, %277 : vector<8x128xf32>
    %279 = arith.truncf %244 : vector<8x128xf32> to vector<8x128xbf16>
    %280 = arith.truncf %220 : vector<8x128xf32> to vector<8x128xbf16>
    %c5 = arith.constant 5 : index
    %c0_184 = arith.constant 0 : index
    %c0_185 = arith.constant 0 : index
    %281 = vector.load %arg3[%c5, %c0_184, %c0_185] : memref<6x128x128xbf16, #tpu.memory_space<vmem>>, vector<1x128x128xbf16>
    %282 = vector.shape_cast %281 : vector<1x128x128xbf16> to vector<128x128xbf16>
    %cst_186 = arith.constant dense<0.000000e+00> : vector<8x128xf32>
    %283 = tpu.matmul %279, %282, %cst_186 {dimension_numbers = #tpu.dot_dimension_numbers<[1], [0], [0], [1], [0, 0, 1, 1], [], []>} : vector<8x128xbf16>, vector<128x128xbf16>, vector<8x128xf32> -> vector<8x128xf32>
    %c5_187 = arith.constant 5 : index
    %c0_188 = arith.constant 0 : index
    %c0_189 = arith.constant 0 : index
    %284 = vector.load %arg4[%c5_187, %c0_188, %c0_189] : memref<6x128x128xbf16, #tpu.memory_space<vmem>>, vector<1x128x128xbf16>
    %285 = vector.shape_cast %284 : vector<1x128x128xbf16> to vector<128x128xbf16>
    %cst_190 = arith.constant dense<0.000000e+00> : vector<8x128xf32>
    %286 = tpu.matmul %280, %285, %cst_190 {dimension_numbers = #tpu.dot_dimension_numbers<[1], [0], [0], [1], [0, 0, 1, 1], [], []>} : vector<8x128xbf16>, vector<128x128xbf16>, vector<8x128xf32> -> vector<8x128xf32>
    %c5_191 = arith.constant 5 : index
    %c0_192 = arith.constant 0 : index
    %c0_193 = arith.constant 0 : index
    %287 = vector.load %arg5[%c5_191, %c0_192, %c0_193] : memref<6x128x128xbf16, #tpu.memory_space<vmem>>, vector<1x128x128xbf16>
    %288 = vector.shape_cast %287 : vector<1x128x128xbf16> to vector<128x128xbf16>
    %cst_194 = arith.constant dense<0.000000e+00> : vector<8x128xf32>
    %289 = tpu.matmul %280, %288, %cst_194 {dimension_numbers = #tpu.dot_dimension_numbers<[1], [0], [0], [1], [0, 0, 1, 1], [], []>} : vector<8x128xbf16>, vector<128x128xbf16>, vector<8x128xf32> -> vector<8x128xf32>
    %290 = arith.truncf %283 : vector<8x128xf32> to vector<8x128xbf16>
    %291 = arith.truncf %286 : vector<8x128xf32> to vector<8x128xbf16>
    %cst_195 = arith.constant dense<0.000000e+00> : vector<8x8xf32>
    %292 = tpu.matmul %290, %291, %cst_195 {dimension_numbers = #tpu.dot_dimension_numbers<[1], [1], [0], [0], [0, 0, 1, 0], [], []>} : vector<8x128xbf16>, vector<8x128xbf16>, vector<8x8xf32> -> vector<8x8xf32>
    %cst_196 = arith.constant 0.176776692 : f32
    %293 = vector.broadcast %cst_196 : f32 to vector<8x8xf32>
    %294 = arith.mulf %292, %293 : vector<8x8xf32>
    %cst_197 = arith.constant dense<0xFF800000> : vector<8xf32>
    %295 = vector.multi_reduction <maximumf>, %294, %cst_197 [1] : vector<8x8xf32> to vector<8xf32>
    %296 = vector.shape_cast %295 : vector<8xf32> to vector<8x1xf32>
    %297 = vector.broadcast %296 : vector<8x1xf32> to vector<8x8xf32>
    %298 = arith.subf %294, %297 : vector<8x8xf32>
    %299 = math.exp %298 : vector<8x8xf32>
    %cst_198 = arith.constant dense<0.000000e+00> : vector<8xf32>
    %300 = vector.multi_reduction <add>, %299, %cst_198 [1] : vector<8x8xf32> to vector<8xf32>
    %301 = vector.shape_cast %300 : vector<8xf32> to vector<8x1xf32>
    %302 = tpu.reciprocal %301 {approx = true} : vector<8x1xf32> -> vector<8x1xf32>
    %303 = vector.broadcast %302 : vector<8x1xf32> to vector<8x8xf32>
    %304 = arith.mulf %299, %303 : vector<8x8xf32>
    %305 = arith.truncf %304 : vector<8x8xf32> to vector<8x8xbf16>
    %306 = arith.truncf %289 : vector<8x128xf32> to vector<8x128xbf16>
    %cst_199 = arith.constant dense<0.000000e+00> : vector<8x128xf32>
    %307 = tpu.matmul %305, %306, %cst_199 {dimension_numbers = #tpu.dot_dimension_numbers<[1], [0], [0], [1], [0, 0, 1, 1], [], []>} : vector<8x8xbf16>, vector<8x128xbf16>, vector<8x128xf32> -> vector<8x128xf32>
    %308 = arith.truncf %307 : vector<8x128xf32> to vector<8x128xbf16>
    %c5_200 = arith.constant 5 : index
    %c0_201 = arith.constant 0 : index
    %c0_202 = arith.constant 0 : index
    %309 = vector.load %arg6[%c5_200, %c0_201, %c0_202] : memref<6x128x128xbf16, #tpu.memory_space<vmem>>, vector<1x128x128xbf16>
    %310 = vector.shape_cast %309 : vector<1x128x128xbf16> to vector<128x128xbf16>
    %cst_203 = arith.constant dense<0.000000e+00> : vector<8x128xf32>
    %311 = tpu.matmul %308, %310, %cst_203 {dimension_numbers = #tpu.dot_dimension_numbers<[1], [0], [0], [1], [0, 0, 1, 1], [], []>} : vector<8x128xbf16>, vector<128x128xbf16>, vector<8x128xf32> -> vector<8x128xf32>
    %312 = arith.addf %244, %311 : vector<8x128xf32>
    %c0_204 = arith.constant 0 : index
    %c0_205 = arith.constant 0 : index
    %c0_206 = arith.constant 0 : index
    %313 = vector.load %arg9[%c0_204, %c0_205, %c0_206] : memref<1x8x128xf32, #tpu.memory_space<vmem>>, vector<1x8x128xf32>
    %314 = vector.shape_cast %313 : vector<1x8x128xf32> to vector<8x128xf32>
    %315 = vector.shape_cast %278 : vector<8x128xf32> to vector<1x8x128xf32>
    tpu.vector_store %arg9[%c0_204, %c0_205, %c0_206], %315 {strides = array<i32>} : memref<1x8x128xf32, #tpu.memory_space<vmem>>, vector<1x8x128xf32>,
    %c0_207 = arith.constant 0 : index
    %c0_208 = arith.constant 0 : index
    %c0_209 = arith.constant 0 : index
    %316 = vector.load %arg10[%c0_207, %c0_208, %c0_209] : memref<1x8x128xf32, #tpu.memory_space<vmem>>, vector<1x8x128xf32>
    %317 = vector.shape_cast %316 : vector<1x8x128xf32> to vector<8x128xf32>
    %318 = vector.shape_cast %312 : vector<8x128xf32> to vector<1x8x128xf32>
    tpu.vector_store %arg10[%c0_207, %c0_208, %c0_209], %318 {strides = array<i32>} : memref<1x8x128xf32, #tpu.memory_space<vmem>>, vector<1x8x128xf32>,
    return
  }
  func.func @transform_0(%arg0: i32) -> (i32, i32, i32) {
    %c0_i32 = arith.constant 0 : i32
    %c0_i32_0 = arith.constant 0 : i32
    %c0_i32_1 = arith.constant 0 : i32
    return %arg0, %c0_i32, %c0_i32_0 : i32, i32, i32
  }
  func.func @transform_1(%arg0: i32) -> (i32, i32, i32) {
    %c0_i32 = arith.constant 0 : i32
    %c0_i32_0 = arith.constant 0 : i32
    %c0_i32_1 = arith.constant 0 : i32
    return %arg0, %c0_i32, %c0_i32_0 : i32, i32, i32
  }
  func.func @transform_2(%arg0: i32) -> (i32, i32, i32) {
    %c0_i32 = arith.constant 0 : i32
    %c0_i32_0 = arith.constant 0 : i32
    %c0_i32_1 = arith.constant 0 : i32
    %c0_i32_2 = arith.constant 0 : i32
    return %c0_i32, %c0_i32_0, %c0_i32_1 : i32, i32, i32
  }
  func.func @transform_3(%arg0: i32) -> (i32, i32, i32) {
    %c0_i32 = arith.constant 0 : i32
    %c0_i32_0 = arith.constant 0 : i32
    %c0_i32_1 = arith.constant 0 : i32
    %c0_i32_2 = arith.constant 0 : i32
    return %c0_i32, %c0_i32_0, %c0_i32_1 : i32, i32, i32
  }
  func.func @transform_4(%arg0: i32) -> (i32, i32, i32) {
    %c0_i32 = arith.constant 0 : i32
    %c0_i32_0 = arith.constant 0 : i32
    %c0_i32_1 = arith.constant 0 : i32
    %c0_i32_2 = arith.constant 0 : i32
    return %c0_i32, %c0_i32_0, %c0_i32_1 : i32, i32, i32
  }
  func.func @transform_5(%arg0: i32) -> (i32, i32, i32) {
    %c0_i32 = arith.constant 0 : i32
    %c0_i32_0 = arith.constant 0 : i32
    %c0_i32_1 = arith.constant 0 : i32
    %c0_i32_2 = arith.constant 0 : i32
    return %c0_i32, %c0_i32_0, %c0_i32_1 : i32, i32, i32
  }
  func.func @transform_6(%arg0: i32) -> (i32, i32, i32, i32) {
    %c0_i32 = arith.constant 0 : i32
    %c0_i32_0 = arith.constant 0 : i32
    %c0_i32_1 = arith.constant 0 : i32
    %c0_i32_2 = arith.constant 0 : i32
    %c0_i32_3 = arith.constant 0 : i32
    return %c0_i32, %c0_i32_0, %c0_i32_1, %c0_i32_2 : i32, i32, i32, i32
  }
  func.func @transform_7(%arg0: i32) -> (i32, i32, i32) {
    %c0_i32 = arith.constant 0 : i32
    %c0_i32_0 = arith.constant 0 : i32
    %c0_i32_1 = arith.constant 0 : i32
    %c0_i32_2 = arith.constant 0 : i32
    return %c0_i32, %c0_i32_0, %c0_i32_1 : i32, i32, i32
  }
  func.func @transform_8(%arg0: i32) -> (i32, i32, i32) {
    %c0_i32 = arith.constant 0 : i32
    %c0_i32_0 = arith.constant 0 : i32
    %c0_i32_1 = arith.constant 0 : i32
    return %arg0, %c0_i32, %c0_i32_0 : i32, i32, i32
  }
  func.func @transform_9(%arg0: i32) -> (i32, i32, i32) {
    %c0_i32 = arith.constant 0 : i32
    %c0_i32_0 = arith.constant 0 : i32
    %c0_i32_1 = arith.constant 0 : i32
    return %arg0, %c0_i32, %c0_i32_0 : i32, i32, i32
  }
}

</mosaic_0001>

<bundles_post_ra>
// kernel: cross_block_forward.1
= control target key start
LH: loop header
LB: loop body
LE: loop exit
PB: predicated region body
PF: predicated region fallthrough
CT: control target
= control target key end

     0   :  { %s6024_s0 = inlined_call_operand.vmem [shape: f32[2,8,128], index: 0, kind: input, shape index: {}]   ;;  %s6025_s1 = inlined_call_operand.vmem [shape: f32[2,8,128], index: 1, kind: input, shape index: {}]   ;;  %s6026_s2 = inlined_call_operand.hbm [shape: bf16[6,128,128], index: 2, kind: input, shape index: {}]   ;;  %s6027_s3 = inlined_call_operand.hbm [shape: bf16[6,128,128], index: 3, kind: input, shape index: {}]   ;;  %s6028_s4 = inlined_call_operand.hbm [shape: bf16[6,128,128], index: 4, kind: input, shape index: {}]   ;;  %s6029_s5 = inlined_call_operand.hbm [shape: bf16[6,128,128], index: 5, kind: input, shape index: {}]   ;;  %s6030_s6 = inlined_call_operand.hbm [shape: bf16[4,3,128,128], index: 6, kind: input, shape index: {}]   ;;  %s6031_s7 = inlined_call_operand.vmem [shape: f32[4,1,128], index: 7, kind: input, shape index: {}]   ;;  %s6032_s8 = inlined_call_operand.hbm [shape: f32[2,8,128], index: 8, kind: output, shape index: {0}]   ;;  %s6033_s9 = inlined_call_operand.hbm [shape: f32[2,8,128], index: 9, kind: output, shape index: {1}]  }
   0x1   :  { %6037 = sst [smem:[#allocation22_spill]] %s6027_s3 }
   0x2   :  { %6038 = sst [smem:[#allocation23_spill]] %s6029_s5 }
   0x3   :  { %15 = vsyncpa [#allocation3], 0 }
   0x4   :  { %16 = vsyncpa [#allocation6], 0 }
   0x5   :  { %17 = vsyncpa [#allocation9], 0 }
   0x6   :  { %18 = vsyncpa [#allocation4], 0 }
   0x7   :  { %20 = vsyncpa [#allocation4 + $0x1], 0 }
   0x8   :  { %21 = vsyncpa [#allocation13], 0 }
   0x9   :  { %23 = vsyncpa [#allocation13 + $0x1], 0  ;;  %s5724_s30 = smov 0   ;;  %s5726_s10 = smov 0  }
   0xa   :  { %s5728_s11 = smov 0   ;;  %s5730_s12 = smov 0  }
   0xb LB: > { %6039 = sst [smem:[#allocation19_spill]] %s5660_s11  ;;  %s5745_s13 = sadd.s32 4294967295, %s5664_s12   ;;  %s5664_s12 = sphi %s5730_s12, %s6048_s12   ;;  %s5660_s11 = sphi %s5728_s11, %s6050_s11   ;;  %s5656_s10 = sphi %s5726_s10, %s6052_s10   ;;  %s5652_s30 = sphi %s5724_s30, %s6051_s30  }
   0xc   : > { %s3807_s14 = sadd.s32 4294967294, %s5664_s12   ;;  %s5749_s15 = sadd.s32 1, %s5664_s12  }
   0xd   : > { %6040 = sst [smem:[#allocation20_spill]] %s5749_s15  ;;  %s214_s16 = sadd.s32 1, %s5660_s11 }
   0xe   : > { %s211_s17 = ssub.s32 %s5664_s12, %s5749_s15  ;;  %p224_p0 = scmp.ne.s32.totalorder %s5660_s11, %s5656_s10 }
   0xf   : > { %p212_p1 = scmp.eq.s32.totalorder %s211_s17, 0  ;;  %p225_p2 = scmp.eq.s32.totalorder %s5745_s13, 1 }
  0x10   : > { %p230_p3 = scmp.ne.s32.totalorder %s5656_s10, %s5652_s30  ;;  %p231_p4 = scmp.eq.s32.totalorder %s3807_s14, 1 }
  0x11   : > { %s5760_s18 = scalar_select %p212_p1, %s5660_s11, %s214_s16  }
  0x12   : > { %p5762_p5 = por %p225_p2, %p224_p0  ;;  %p5766_p6 = por %p231_p4, %p230_p3 }
  0x13   : > { %6041 = sst [smem:[#allocation21_spill]] %s5760_s18  ;;  %p3808_p7 = scmp.ge.s32.totalorder %s5664_s12, 1 }
  0x14   : > { %p264_p8 = scmp.lt.s32.totalorder %s5664_s12, 3  ;;  %p5329_p9 = scmp.eq.s32.totalorder %s5745_s13, 0 }
  0x15   : > { %s6045_s3 = sld [smem:[#allocation22_spill]]  ;;  %s5666_s29 = smov [#allocation5]  }
  0x16   : > { %p5773_p10 = pnand %p3808_p7, %p264_p8  ;;  %s6046_s5 = sld [smem:[#allocation23_spill]] }
  0x17   : > { %s291_s14 = sshll.u32 %s5666_s29, 4  ;;  %s5667_s16 = smov 64   ;;  %s292_s14 = int_to_ptr.vmem [resolvable:$true] %s291_s14 }
  0x18   : > { %p5306_p11 = pneg %p5773_p10  ;;  %s5668_s17 = smov 4  }
  0x19   : > { %s5669_s22 = smov [#allocation8]   ;;  %s303_s18 = sshll.u32 %s6028_s4, 4  ;;  %s304_s18 = int_to_ptr.hbm [resolvable:$true] %s303_s18 }
  0x1a   : > { %p5787_p12 = pnand %p5329_p9, %p5306_p11  ;;  %s319_s23 = sshll.u32 %s5669_s22, 4  ;;  %s320_s23 = int_to_ptr.vmem [resolvable:$true] %s319_s23 }
  0x1b   : > { %s289_s24 = sshll.u32 %s6045_s3, 4  ;;  %s275_s3 = sshll.u32 %s6026_s2, 4  ;;  %s290_s24 = int_to_ptr.hbm [resolvable:$true] %s289_s24  ;;  %s276_s3 = int_to_ptr.hbm [resolvable:$true] %s275_s3 }
  0x1c   : > { %s317_s27 = sshll.u32 %s6046_s5, 4  ;;  %s5670_s11 = smov [#allocation2]   ;;  %s318_s27 = int_to_ptr.hbm [resolvable:$true] %s317_s27 }
  0x1d   : > { %5312 = dma.hbm_to_vmem [thread:$0]  (!%p5787_p12), %s290_s24, 6144, %s292_s14, [#allocation6], %s5667_s16, %s5667_s16, %s5668_s17  }
  0x1e   : > { %5318 = dma.hbm_to_vmem [thread:$0]  (!%p5787_p12), %s318_s27, 6144, %s320_s23, [#allocation9], %s5667_s16, %s5667_s16, %s5668_s17  }
  0x1f   : > { %s277_s15 = sshll.u32 %s5670_s11, 4  ;;  %s5671_s24 = smov [#allocation7]   ;;  %s278_s15 = int_to_ptr.vmem [resolvable:$true] %s277_s15 }
  0x20   : > { %5309 = dma.hbm_to_vmem [thread:$0]  (!%p5787_p12), %s276_s3, 6144, %s278_s15, [#allocation3], %s5667_s16, %s5667_s16, %s5668_s17  }
  0x21   : > { %s305_s14 = sshll.u32 %s5671_s24, 4  ;;  %s331_s26 = sshll.u32 %s6030_s6, 4  ;;  %s306_s14 = int_to_ptr.vmem [resolvable:$true] %s305_s14  ;;  %s332_s26 = int_to_ptr.hbm [resolvable:$true] %s331_s26 }
  0x22   : > { %5315 = dma.hbm_to_vmem [thread:$0]  (!%p5787_p12), %s304_s18, 6144, %s306_s14, [#allocation6], %s5667_s16, %s5667_s16, %s5668_s17  }
  0x23   : > { %s5672_s27 = smov [#allocation10]   ;;  %366 = sbr.rel (%p5773_p10) target bundleno = 4327 (0x10e7), region = 52 }
  0x24   : > { %s333_s5 = sshll.u32 %s5672_s27, 4  ;;  %s334_s5 = int_to_ptr.vmem [resolvable:$true] %s333_s5 }
  0x25   : > { %5321 = dma.hbm_to_vmem [thread:$0]  (!%p5787_p12), %s332_s26, 12288, %s334_s5, [#allocation9], %s5667_s16, %s5667_s16, %s5668_s17  }
  0x28   : > { %5631 = dma.done.wait (%p5329_p9), [#allocation3], 6144  }
  0x29   : > { %5633 = vsyncadd (%p5329_p9), [#allocation3], 4294961152 }
  0x2a   : > { %5635 = dma.done.wait (%p5329_p9), [#allocation6], 12288  }
  0x2b   : > { %5637 = vsyncadd (%p5329_p9), [#allocation6], 4294955008 }
  0x2c   : > { %5639 = dma.done.wait (%p5329_p9), [#allocation9], 18432  }
  0x2d   : > { %5641 = vsyncadd (%p5329_p9), [#allocation9], 4294948864  ;;  %v5001_v0 = vld [vmem:[#allocation2 + $0x38] sm:$0xff]  ;;  %v5000_v2 = vld [vmem:[#allocation2 + $0x30] sm:$0xff]  ;;  %p431_p13 = scmp.lt.s32.totalorder %s5745_s13, 1  ;;  %vm699_vm0 = vcmask 64512  }
  0x2e   : > { %v5009_v1 = vld [vmem:[#allocation5 + $0x38] sm:$0xff]  ;;  %516 = vmatpush.bf16.msra.mxu0 %v5001_v0  ;;  %v5008_v3 = vld [vmem:[#allocation5 + $0x30] sm:$0xff]  ;;  %v4999_v4 = vld [vmem:[#allocation2 + $0x28] sm:$0xff]  ;;  %vm716_vm1 = vcmask 1043456   ;;  %s5962_s5 = sand.u32 1, %s5656_s10   ;;  %s4990_s15 = sshll.u32 %s5745_s13, 3 }
  0x2f   : > { %593 = vmatpush.bf16.msra.mxu1 %v5009_v1  ;;  %v5007_v5 = vld [vmem:[#allocation5 + $0x28] sm:$0xff]  ;;  %v4998_v6 = vld [vmem:[#allocation2 + $0x20] sm:$0xff]  ;;  %v4997_v8 = vld [vmem:[#allocation2 + $0x18] sm:$0xff]  ;;  %s432_s3 = scalar_select %p431_p13, %s5745_s13, 1 }
  0x30   : > { %v5006_v7 = vld [vmem:[#allocation5 + $0x20] sm:$0xff]  ;;  %v5005_v9 = vld [vmem:[#allocation5 + $0x18] sm:$0xff]  ;;  %v4996_v10 = vld [vmem:[#allocation2 + $0x10] sm:$0xff]  ;;  %s3634_s28 = scalar_lea.hbm %s6032_s8, %s4990_s15  ;;  %s3619_s23 = scalar_lea.sflag [#allocation4], %s5962_s5 }
  0x31   : > { %v5004_v11 = vld [vmem:[#allocation5 + $0x10] sm:$0xff]  ;;  %s3823_s11 = sshll.u32 %s432_s3, 3  ;;  %v4995_v12 = vld [vmem:[#allocation2 + $0x8] sm:$0xff]  ;;  %v4994_v14 = vld [vmem:[#allocation2] sm:$0xff]  ;;  %s3821_s3 = sshll.u32 %s5962_s5, 3 }
  0x32   : > { %517 = vmatpush.bf16.msra.mxu0 %v5000_v2  ;;  %v5003_v13 = vld [vmem:[#allocation5 + $0x8] sm:$0xff]  ;;  %s434_s21 = scalar_lea.vmem %s6024_s0, %s3823_s11  ;;  %s438_s17 = scalar_lea.vmem %s6025_s1, %s3823_s11  ;;  %v5002_v15 = vld [vmem:[#allocation5] sm:$0xff]  ;;  %v5017_v26 = vld [vmem:[#allocation7 + $0x38] sm:$0xff] }
  0x33   : > { %594 = vmatpush.bf16.msra.mxu1 %v5008_v3  ;;  %v5832_v16 = vld [vmem:[%s434_s21] sm:$0xff]  ;;  %670 = vmatpush.bf16.msra.mxu2 %v5017_v26  ;;  %v5016_v27 = vld [vmem:[#allocation7 + $0x30] sm:$0xff]  ;;  %v5015_v28 = vld [vmem:[#allocation7 + $0x28] sm:$0xff]  ;;  %s5968_s11 = scalar_lea.vmem [#allocation11], %s3821_s3  ;;  %s5578_s13 = scalar_lea.hbm %s6032_s8, 16 }
  0x34   : > { %v5834_v17 = vld [vmem:[%s438_s17] sm:$0xff]  ;;  %v5838_v18 = vpack.c.bf16 %v5832_v16, %v5832_v16  ;;  %v5013_v30 = vld [vmem:[#allocation7 + $0x18] sm:$0xff]  ;;  %v5012_v31 = vld [vmem:[#allocation7 + $0x10] sm:$0xff]  ;;  %s3636_s16 = sshll.u32 %s5968_s11, 4  ;;  %s3638_s17 = sshll.u32 %s3634_s28, 4  ;;  %s3637_s16 = int_to_ptr.vmem [resolvable:$true] %s3636_s16  ;;  %s3639_s17 = int_to_ptr.hbm [resolvable:$true] %s3638_s17 }
  0x35   : > { %v5842_v19 = vpack.c.bf16 %v5834_v17, %v5834_v17  ;;  %v5014_v29 = vld [vmem:[#allocation7 + $0x20] sm:$0xff]  ;;  %v5011_v32 = vld [vmem:[#allocation7 + $0x8] sm:$0xff]  ;;  %v5041_v38 = vld [vmem:[#allocation5 + $0x78] sm:$0xff]  ;;  %s5572_s29 = sshra.s32 %s3639_s17, 4  ;;  %s5573_s29 = int_to_ptr.hbm [resolvable:$true] %s5572_s29 }
  0x36   : > { %518 = vmatpush.bf16.msra.mxu0 %v4999_v4  ;;  %v5010_v35 = vld [vmem:[#allocation7] sm:$0xff]  ;;  %v5040_v39 = vld [vmem:[#allocation5 + $0x70] sm:$0xff]  ;;  %v5033_v40 = vld [vmem:[#allocation2 + $0x78] sm:$0xff]  ;;  %s5574_s24 = scalar_lea.hbm %s5573_s29, 8  ;;  %p5579_p3 = scmp.lt.s32.totalorder %s5573_s29, %s6032_s8 }
  0x37   : > { %595 = vmatpush.bf16.msra.mxu1 %v5007_v5  ;;  %671 = vmatpush.bf16.msra.mxu2 %v5016_v27  ;;  %v5039_v41 = vld [vmem:[#allocation5 + $0x68] sm:$0xff]  ;;  %v5032_v42 = vld [vmem:[#allocation2 + $0x70] sm:$0xff]  ;;  %v5038_v43 = vld [vmem:[#allocation5 + $0x60] sm:$0xff]  ;;  %p5575_p0 = scmp.ne.s32.totalorder %s5573_s29, %s5574_s24  ;;  %p5580_p4 = scmp.lt.s32.totalorder %s5578_s13, %s5574_s24 }
  0x38   : > { %v5031_v51 = vld [vmem:[#allocation2 + $0x68] sm:$0xff]  ;;  %v5037_v52 = vld [vmem:[#allocation5 + $0x58] sm:$0xff]  ;;  %v5030_v54 = vld [vmem:[#allocation2 + $0x60] sm:$0xff] }
  0x39   : > { %v5036_v55 = vld [vmem:[#allocation5 + $0x50] sm:$0xff]  ;;  %v5029_v57 = vld [vmem:[#allocation2 + $0x58] sm:$0xff]  ;;  %v5035_v58 = vld [vmem:[#allocation5 + $0x48] sm:$0xff]  ;;  %p5576_p1 = pnand %p5575_p0, %p5762_p5  ;;  %p5581_p7 = por %p5580_p4, %p5579_p3 }
  0x3a   : > { %519 = vmatpush.bf16.msra.mxu0 %v4998_v6  ;;  %v5028_v59 = vld [vmem:[#allocation2 + $0x50] sm:$0xff]  ;;  %v5034_v60 = vld [vmem:[#allocation5 + $0x40] sm:$0xff]  ;;  %v5025_v61 = vld [vmem:[#allocation8 + $0x38] sm:$0xff] }
  0x3b   : > { %596 = vmatpush.bf16.msra.mxu1 %v5006_v7  ;;  %672 = vmatpush.bf16.msra.mxu2 %v5015_v28  ;;  %v5027_v62 = vld [vmem:[#allocation2 + $0x48] sm:$0xff]  ;;  %v5024_v63 = vld [vmem:[#allocation8 + $0x30] sm:$0xff]  ;;  %v5026_v0 = vld [vmem:[#allocation2 + $0x40] sm:$0xff]  ;;  %p5577_p2 = pneg %p5576_p1 }
  0x3c   : > { %v5023_v1 = vld [vmem:[#allocation8 + $0x28] sm:$0xff]  ;;  %v5022_v2 = vld [vmem:[#allocation8 + $0x20] sm:$0xff]  ;;  %v5021_v3 = vld [vmem:[#allocation8 + $0x18] sm:$0xff] }
  0x3d   : > { %v5020_v5 = vld [vmem:[#allocation8 + $0x10] sm:$0xff]  ;;  %v5019_v6 = vld [vmem:[#allocation8 + $0x8] sm:$0xff]  ;;  %v5045_v26 = vld [vmem:[#allocation7 + $0x58] sm:$0xff]  ;;  %p5582_p8 = pnand %p5581_p7, %p5577_p2 }
  0x3e   : > { %520 = vmatpush.bf16.msra.mxu0 %v4997_v8  ;;  %v5064_v27 = vld [vmem:[#allocation10 + $0x30] sm:$0xff] }
  0x3f   : > { %597 = vmatpush.bf16.msra.mxu1 %v5005_v9  ;;  %673 = vmatpush.bf16.msra.mxu2 %v5014_v29  ;;  %v5044_v28 = vld [vmem:[#allocation7 + $0x50] sm:$0xff] }
  0x42   : > { %521 = vmatpush.bf16.msra.mxu0 %v4996_v10  ;;  %v5018_v10 = vld [vmem:[#allocation8] sm:$0xff] }
  0x43   : > { %598 = vmatpush.bf16.msra.mxu1 %v5004_v11  ;;  %674 = vmatpush.bf16.msra.mxu2 %v5013_v30  ;;  %v5063_v30 = vld [vmem:[#allocation10 + $0x28] sm:$0xff] }
  0x46   : > { %522 = vmatpush.bf16.msra.mxu0 %v4995_v12 }
  0x47   : > { %599 = vmatpush.bf16.msra.mxu1 %v5003_v13  ;;  %675 = vmatpush.bf16.msra.mxu2 %v5012_v31  ;;  %v5043_v31 = vld [vmem:[#allocation7 + $0x48] sm:$0xff] }
  0x4a   : > { %523 = vmatpush.bf16.msra.mxu0 %v4994_v14 }
  0x4b   : > { %600 = vmatpush.bf16.msra.mxu1 %v5002_v15  ;;  %676 = vmatpush.bf16.msra.mxu2 %v5011_v32  ;;  %v442_v32 = vlaneseq }
  0x4d   : > { %524 = vmatmul.bf16.vlgmr.msra.gmra.mxu0 %v5838_v18 }
  0x4e   : > { %601 = vmatmul.bf16.vlgmr.msra.gmra.mxu1 %v5842_v19  ;;  %877 = vmatpush.bf16.msrb.mxu0 %v5033_v40  ;;  %v5061_v40 = vld [vmem:[#allocation10 + $0x18] sm:$0xff] }
  0x4f   : > { %677 = vmatpush.bf16.msra.mxu2 %v5010_v35  ;;  %955 = vmatpush.bf16.msrb.mxu1 %v5041_v38  ;;  %v5042_v35 = vld [vmem:[#allocation7 + $0x40] sm:$0xff]  ;;  %v5673_v38 = vmov 0.0  }
  0x52   : > { %678 = vmatmul.bf16.vlgmr.msra.gmra.mxu2 %v5842_v19  ;;  %878 = vmatpush.bf16.msrb.mxu0 %v5032_v42  ;;  %v5060_v42 = vld [vmem:[#allocation10 + $0x10] sm:$0xff] }
  0x53   : > { %956 = vmatpush.bf16.msrb.mxu1 %v5040_v39 }
  0x56   : > { %879 = vmatpush.bf16.msrb.mxu0 %v5031_v51 }
  0x57   : > { %957 = vmatpush.bf16.msrb.mxu1 %v5039_v41  ;;  %v5072_v41 = vld [vmem:[#allocation10 + $0x70] sm:$0xff] }
  0x5a   : > { %880 = vmatpush.bf16.msrb.mxu0 %v5030_v54 }
  0x5b   : > { %958 = vmatpush.bf16.msrb.mxu1 %v5038_v43  ;;  %v5071_v43 = vld [vmem:[#allocation10 + $0x68] sm:$0xff] }
  0x5e   : > { %881 = vmatpush.bf16.msrb.mxu0 %v5029_v57 }
  0x5f   : > { %959 = vmatpush.bf16.msrb.mxu1 %v5037_v52 }
  0x62   : > { %882 = vmatpush.bf16.msrb.mxu0 %v5028_v59 }
  0x63   : > { %960 = vmatpush.bf16.msrb.mxu1 %v5036_v55 }
  0x66   : > { %883 = vmatpush.bf16.msrb.mxu0 %v5027_v62 }
  0x67   : > { %961 = vmatpush.bf16.msrb.mxu1 %v5035_v58 }
  0x6a   : > { %884 = vmatpush.bf16.msrb.mxu0 %v5026_v0 }
  0x6b   : > { %962 = vmatpush.bf16.msrb.mxu1 %v5034_v60 }
  0x6d   : > { %885 = vmatmul.bf16.vlgmr.msrb.gmra.mxu0 %v5842_v19  ;;  %v5049_v19 = vld [vmem:[#allocation7 + $0x78] sm:$0xff] }
  0x6e   : > { %963 = vmatmul.bf16.vlgmr.msrb.gmra.mxu1 %v5838_v18  ;;  %1033 = vmatpush.bf16.msrb.mxu2 %v5049_v19  ;;  %v5076_v19 = vld [vmem:[#allocation10 + $0x90] sm:$0xff] }
  0xca   : > { %v525_v20 = vpop.f32.mrf.mxu0 }
  0xcb   : > { %v602_v21 = vpop.f32.mrf.mxu1  ;;  %v683_v23 = vpack.c.bf16 %v525_v20, %v525_v20  ;;  %v5048_v20 = vld [vmem:[#allocation7 + $0x70] sm:$0xff] }
  0xcc   : > { %v684_v22 = vpack.c.bf16 %v602_v21, %v602_v21  ;;  %1034 = vmatpush.bf16.msrb.mxu2 %v5048_v20  ;;  %v5047_v21 = vld [vmem:[#allocation7 + $0x68] sm:$0xff] }
  0xcd   : > { %v5075_v20 = vld [vmem:[#allocation10 + $0x88] sm:$0xff] }
  0xce   : > { %692 = vmatpush.bf16.xpose.msra.mxu3 %v684_v22  ;;  %v5046_v22 = vld [vmem:[#allocation7 + $0x60] sm:$0xff] }
  0xd0   : > { %1035 = vmatpush.bf16.msrb.mxu2 %v5047_v21  ;;  %v5074_v21 = vld [vmem:[#allocation10 + $0x80] sm:$0xff] }
  0xd2   : > { %v527_v24 = vpop.f32.mrf.mxu0 }
  0xd3   : > { %v604_v25 = vpop.f32.mrf.mxu1  ;;  %v5065_v24 = vld [vmem:[#allocation10 + $0x38] sm:$0xff] }
  0xd4   : > { %1036 = vmatpush.bf16.msrb.mxu2 %v5046_v22  ;;  %v5057_v22 = vld [vmem:[#allocation8 + $0x78] sm:$0xff] }
  0xd5   : > { %693 = vmatmul.bf16.vlgmr.msra.gmra.mxu3 %v683_v23  ;;  %v679_v49 = vpop.f32.mrf.mxu2  ;;  %1160 = vmatpush.bf16.msra.mxu1 %v5057_v22 }
  0xd6   : > { %v712_v53 = vpack.c.bf16 %v679_v49, %v679_v49  ;;  %v5059_v49 = vld [vmem:[#allocation10 + $0x8] sm:$0xff] }
  0xd8   : > { %v718_v56 = vsel %vm716_vm1, %v712_v53, 0  ;;  %1037 = vmatpush.bf16.msrb.mxu2 %v5045_v26  ;;  %v5054_v26 = vld [vmem:[#allocation8 + $0x60] sm:$0xff] }
  0xd9   : > { %727 = vmatpush.bf16.msrb.mxu3 %v718_v56 }
  0xdc   : > { %1038 = vmatpush.bf16.msrb.mxu2 %v5044_v28 }
  0xdd   : > { %v681_v50 = vpop.f32.mrf.mxu2  ;;  %798 = vmatpush.bf16.msra.mxu3 %v5025_v61 }
  0xde   : > { %v5058_v50 = vld [vmem:[#allocation10] sm:$0xff] }
  0xe0   : > { %1039 = vmatpush.bf16.msrb.mxu2 %v5043_v31  ;;  %v5053_v31 = vld [vmem:[#allocation8 + $0x58] sm:$0xff] }
  0xe1   : > { %799 = vmatpush.bf16.msra.mxu3 %v5024_v63 }
  0xe4   : > { %1040 = vmatpush.bf16.msrb.mxu2 %v5042_v35  ;;  %v5051_v35 = vld [vmem:[#allocation8 + $0x48] sm:$0xff] }
  0xe5   : > { %800 = vmatpush.bf16.msra.mxu3 %v5023_v1  ;;  %v5081_v1 = vld [vmem:[#allocation10 + $0xb8] sm:$0xff] }
  0xe7   : > { %1041 = vmatmul.bf16.vlgmr.msrb.gmra.mxu2 %v5838_v18 }
  0xe9   : > { %801 = vmatpush.bf16.msra.mxu3 %v5022_v2 }
  0xea   : > { %v886_v13 = vpop.f32.mrf.mxu0 }
  0xeb   : > { %v964_v11 = vpop.f32.mrf.mxu1 }
  0xec   : > { %v1047_v12 = vpack.c.bf16 %v964_v11, %v964_v11 }
  0xed   : > { %802 = vmatpush.bf16.msra.mxu3 %v5021_v3 }
  0xf1   : > { %803 = vmatpush.bf16.msra.mxu3 %v5020_v5 }
  0xf2   : > { %v888_v15 = vpop.f32.mrf.mxu0 }
  0xf3   : > { %v966_v14 = vpop.f32.mrf.mxu1  ;;  %v5077_v15 = vld [vmem:[#allocation10 + $0x98] sm:$0xff] }
  0xf4   : > { %v5078_v14 = vld [vmem:[#allocation10 + $0xa0] sm:$0xff] }
  0xf5   : > { %804 = vmatpush.bf16.msra.mxu3 %v5019_v6 }
  0xf9   : > { %805 = vmatpush.bf16.msra.mxu3 %v5018_v10 }
 0x158   : > { %v694_v33 = vpop.f32.mrf.mxu3 }
 0x159   : > { %v698_v34 = vmul.f32 0.17677669, %v694_v33  ;;  %v5062_v33 = vld [vmem:[#allocation10 + $0x20] sm:$0xff] }
 0x15b   : > { %v700_v36 = vsel %vm699_vm0, %v698_v34, -inf }
 0x15c   : > { %701 = vmax.xlane.f32.xlu0 %v700_v36  ;;  %v5073_v36 = vld [vmem:[#allocation10 + $0x78] sm:$0xff] }
 0x15d   : > { %1261 = vmatpush.bf16.msra.mxu2 %v5073_v36 }
 0x160   : > { %v696_v37 = vpop.f32.mrf.mxu3 }
 0x161   : > { %v1046_v37 = vpack.c.bf16 %v886_v13, %v886_v13  ;;  %1262 = vmatpush.bf16.msra.mxu2 %v5072_v41  ;;  %v5079_v13 = vld [vmem:[#allocation10 + $0xa8] sm:$0xff]  ;;  %v5110_v41 = vld [vmem:[#allocation2 + $0xa0] sm:$0xff] }
 0x165   : > { %1263 = vmatpush.bf16.msra.mxu2 %v5071_v43  ;;  %v5108_v43 = vld [vmem:[#allocation2 + $0x90] sm:$0xff] }
 0x16a   : > { %v1042_v60 = vpop.f32.mrf.mxu2 }
 0x16b   : > { %v1074_v61 = vpack.c.bf16 %v1042_v60, %v1042_v60  ;;  %v5093_v60 = vld [vmem:[#allocation10 + $0x118] sm:$0xff] }
 0x16d   : > { %v1079_v62 = vsel %vm716_vm1, %v1074_v61, 0  ;;  %v5085_v61 = vld [vmem:[#allocation10 + $0xd8] sm:$0xff] }
 0x16e   : > { %1088 = vmatpush.bf16.msra.mxu0 %v1079_v62 }
 0x172   : > { %v1044_v0 = vpop.f32.mrf.mxu2  ;;  %1401 = vmatpush.bf16.msrb.mxu0 %v5081_v1  ;;  %v5100_v1 = vld [vmem:[#allocation10 + $0x150] sm:$0xff] }
 0x173   : > { %v5084_v0 = vld [vmem:[#allocation10 + $0xd0] sm:$0xff] }
 0x1cf   : > { %v702_v44 = vpop.xlane.xlu0 %701 }
 0x1d0   : > { %v703_v45 = vsub.f32 %v698_v34, %v702_v44  ;;  %v443_v34 = vshrl.u32 %v442_v32, 7  ;;  %v5070_v44 = vld [vmem:[#allocation10 + $0x60] sm:$0xff]  ;;  %v5112_v32 = vld [vmem:[#allocation2 + $0xb0] sm:$0xff] }
 0x1d1   : > { %1264 = vmatpush.bf16.msra.mxu2 %v5070_v44  ;;  %v5107_v44 = vld [vmem:[#allocation2 + $0x88] sm:$0xff] }
 0x1d2   : > { %v704_v46 = vmul.f32 1.442695, %v703_v45  ;;  %vm447_vm2 = vcmp.lt.s32.totalorder %v443_v34, 7  ;;  %v5069_v45 = vld [vmem:[#allocation10 + $0x58] sm:$0xff]  ;;  %vm444_vm3 = vcmp.gt.s32.totalorder %v443_v34, 0 }
 0x1d3   : > { %v5853_v39 = vsel %vm447_vm2, 1.0, %v5673_v38  ;;  %v5859_v52 = vsel %vm444_vm3, 1.0, %v5673_v38  ;;  %v5050_v38 = vld [vmem:[#allocation8 + $0x40] sm:$0xff] }
 0x1d4   : > { %5384 = vpow2.f32 %v704_v46  ;;  %v5068_v46 = vld [vmem:[#allocation10 + $0x50] sm:$0xff] }
 0x1d5   : > { %1265 = vmatpush.bf16.msra.mxu2 %v5069_v45  ;;  %v5106_v45 = vld [vmem:[#allocation2 + $0x80] sm:$0xff] }
 0x1d9   : > { %1266 = vmatpush.bf16.msra.mxu2 %v5068_v46  ;;  %v5097_v46 = vld [vmem:[#allocation10 + $0x138] sm:$0xff] }
 0x1da   : > { %v5385_v47 = vpop.eup %5384 }
 0x1db   : > { %v706_v48 = vsel %vm699_vm0, %v5385_v47, 0.0 }
 0x1dc   : > { %707 = vadd.xlane.f32.xlu0 %v706_v48  ;;  %v5066_v48 = vld [vmem:[#allocation10 + $0x40] sm:$0xff] }
 0x24f   : > { %v708_v4 = vpop.xlane.xlu0 %707 }
 0x250   : > { %5386 = vrcp.f32 %v708_v4 }
 0x256   : > { %v5387_v7 = vpop.eup %5386 }
 0x257   : > { %v710_v8 = vmul.f32 %v5387_v7, %v5385_v47  ;;  %v5067_v47 = vld [vmem:[#allocation10 + $0x48] sm:$0xff] }
 0x258   : > { %1267 = vmatpush.bf16.msra.mxu2 %v5067_v47  ;;  %v5089_v47 = vld [vmem:[#allocation10 + $0xf8] sm:$0xff] }
 0x259   : > { %v711_v9 = vpack.c.bf16 %v710_v8, %v710_v8 }
 0x25b   : > { %3923 = vmatmul.msk.bf16.vlgmr.msrb.gmra.mxu3 %vm699_vm0, %v711_v9 }
 0x25c   : > { %1055 = vmatpush.bf16.xpose.msrb.mxu3 %v1047_v12  ;;  %1268 = vmatpush.bf16.msra.mxu2 %v5066_v48  ;;  %v5080_v12 = vld [vmem:[#allocation10 + $0xb0] sm:$0xff]  ;;  %v5105_v48 = vld [vmem:[#allocation10 + $0x178] sm:$0xff] }
 0x25d   : > { %1402 = vmatpush.bf16.msrb.mxu0 %v5080_v12  ;;  %v5099_v12 = vld [vmem:[#allocation10 + $0x148] sm:$0xff] }
 0x260   : > { %1569 = vmatpush.bf16.msrb.mxu2 %v5089_v47  ;;  %v5152_v47 = vld [vmem:[#allocation5 + $0xf0] sm:$0xff] }
 0x261   : > { %1403 = vmatpush.bf16.msrb.mxu0 %v5079_v13  ;;  %v5082_v13 = vld [vmem:[#allocation10 + $0xc0] sm:$0xff] }
 0x265   : > { %1404 = vmatpush.bf16.msrb.mxu0 %v5078_v14  ;;  %v5098_v14 = vld [vmem:[#allocation10 + $0x140] sm:$0xff] }
 0x269   : > { %1405 = vmatpush.bf16.msrb.mxu0 %v5077_v15  ;;  %v5129_v15 = vld [vmem:[#allocation7 + $0xb8] sm:$0xff] }
 0x26d   : > { %1406 = vmatpush.bf16.msrb.mxu0 %v5076_v19  ;;  %v5120_v19 = vld [vmem:[#allocation5 + $0xb0] sm:$0xff] }
 0x271   : > { %1407 = vmatpush.bf16.msrb.mxu0 %v5075_v20  ;;  %v5128_v20 = vld [vmem:[#allocation7 + $0xb0] sm:$0xff] }
 0x275   : > { %1408 = vmatpush.bf16.msrb.mxu0 %v5074_v21 }
 0x2de   : > { %v729_v23 = vpop.f32.mrf.mxu3 }
 0x2df   : > { %v733_v25 = vpack.c.bf16 %v729_v23, %v729_v23  ;;  %v5056_v23 = vld [vmem:[#allocation8 + $0x70] sm:$0xff] }
 0x2e0   : > { %1161 = vmatpush.bf16.msra.mxu1 %v5056_v23  ;;  %v5119_v23 = vld [vmem:[#allocation5 + $0xa8] sm:$0xff] }
 0x2e1   : > { %806 = vmatmul.bf16.vlgmr.msra.gmra.mxu3 %v733_v25  ;;  %v5055_v25 = vld [vmem:[#allocation8 + $0x68] sm:$0xff] }
 0x2e2   : > { %1322 = vmatpush.bf16.msra.mxu3 %v5065_v24 }
 0x2e4   : > { %1162 = vmatpush.bf16.msra.mxu1 %v5055_v25 }
 0x2e6   : > { %v731_v29 = vpop.f32.mrf.mxu3  ;;  %1323 = vmatpush.bf16.msra.mxu3 %v5064_v27 }
 0x2e7   : > { %v5113_v29 = vld [vmem:[#allocation2 + $0xb8] sm:$0xff] }
 0x2e8   : > { %1163 = vmatpush.bf16.msra.mxu1 %v5054_v26 }
 0x2ea   : > { %1324 = vmatpush.bf16.msra.mxu3 %v5063_v30 }
 0x2ec   : > { %1164 = vmatpush.bf16.msra.mxu1 %v5053_v31  ;;  %v5126_v31 = vld [vmem:[#allocation7 + $0xa0] sm:$0xff] }
 0x2ee   : > { %1325 = vmatpush.bf16.msra.mxu3 %v5062_v33  ;;  %v5052_v33 = vld [vmem:[#allocation8 + $0x50] sm:$0xff] }
 0x2f0   : > { %1165 = vmatpush.bf16.msra.mxu1 %v5052_v33 }
 0x2f1   : > { %1056 = vmatmul.bf16.vlgmr.msrb.gmra.mxu3 %v1046_v37 }
 0x2f2   : > { %1326 = vmatpush.bf16.msra.mxu3 %v5061_v40  ;;  %v5111_v40 = vld [vmem:[#allocation2 + $0xa8] sm:$0xff] }
 0x2f4   : > { %1166 = vmatpush.bf16.msra.mxu1 %v5051_v35  ;;  %v5125_v35 = vld [vmem:[#allocation7 + $0x98] sm:$0xff] }
 0x2f6   : > { %1327 = vmatpush.bf16.msra.mxu3 %v5060_v42  ;;  %v5109_v42 = vld [vmem:[#allocation2 + $0x98] sm:$0xff] }
 0x2f8   : > { %1167 = vmatpush.bf16.msra.mxu1 %v5050_v38  ;;  %v5115_v38 = vld [vmem:[#allocation5 + $0x88] sm:$0xff] }
 0x2fa   : > { %1328 = vmatpush.bf16.msra.mxu3 %v5059_v49  ;;  %v5096_v49 = vld [vmem:[#allocation10 + $0x130] sm:$0xff] }
 0x2fc   : > { %1508 = vmatpush.bf16.msrb.mxu1 %v5097_v46  ;;  %v5161_v46 = vld [vmem:[#allocation7 + $0xf8] sm:$0xff] }
 0x2fe   : > { %1329 = vmatpush.bf16.msra.mxu3 %v5058_v50  ;;  %v5088_v50 = vld [vmem:[#allocation10 + $0xf0] sm:$0xff] }
 0x2ff   : > { %1570 = vmatpush.bf16.msrb.mxu2 %v5088_v50  ;;  %v5159_v50 = vld [vmem:[#allocation7 + $0xe8] sm:$0xff] }
 0x300   : > { %1509 = vmatpush.bf16.msrb.mxu1 %v5096_v49  ;;  %v5151_v49 = vld [vmem:[#allocation5 + $0xe8] sm:$0xff] }
 0x302   : > { %1648 = vmatpush.bf16.msrb.mxu3 %v5105_v48  ;;  %v5160_v48 = vld [vmem:[#allocation7 + $0xf0] sm:$0xff] }
 0x364   : > { %v807_v18 = vpop.f32.mrf.mxu3 }
 0x365   : > { %v5857_v51 = vadd.f32 %v807_v18, %v5832_v16  ;;  %v5104_v18 = vld [vmem:[#allocation10 + $0x170] sm:$0xff] }
 0x366   : > { %1649 = vmatpush.bf16.msrb.mxu3 %v5104_v18  ;;  %v5150_v18 = vld [vmem:[#allocation5 + $0xe0] sm:$0xff] }
 0x367   : > { %v1174_v53 = vrot.slane %v5857_v51, 7  ;;  %v1195_v54 = vpack.c.bf16 %v5857_v51, %v5857_v51  ;;  %v1176_v34 = vrot.slane %v5857_v51, 1  ;;  %v5095_v51 = vld [vmem:[#allocation10 + $0x128] sm:$0xff] }
 0x368   : > { %1510 = vmatpush.bf16.msrb.mxu1 %v5095_v51  ;;  %v5158_v51 = vld [vmem:[#allocation7 + $0xe0] sm:$0xff] }
 0x369   : > { %v1175_v55 = vmul.f32 %v5859_v52, %v1174_v53  ;;  %1269 = vmatmul.bf16.vlgmr.msra.gmra.mxu2 %v1195_v54  ;;  %v1177_v36 = vmul.f32 %v5853_v39, %v1176_v34  ;;  %v5087_v53 = vld [vmem:[#allocation10 + $0xe8] sm:$0xff] }
 0x36a   : > { %v5103_v54 = vld [vmem:[#allocation10 + $0x168] sm:$0xff]  ;;  %1571 = vmatpush.bf16.msrb.mxu2 %v5087_v53  ;;  %v5149_v53 = vld [vmem:[#allocation5 + $0xd8] sm:$0xff] }
 0x36b   : > { %v1178_v56 = vpack.c.bf16 %v1175_v55, %v1175_v55  ;;  %v1335_v37 = vpack.c.bf16 %v1177_v36, %v1177_v36  ;;  %1650 = vmatpush.bf16.msrb.mxu3 %v5103_v54  ;;  %v5116_v36 = vld [vmem:[#allocation5 + $0x90] sm:$0xff]  ;;  %v5157_v54 = vld [vmem:[#allocation7 + $0xd8] sm:$0xff] }
 0x36c   : > { %v809_v57 = vpop.f32.mrf.mxu3 }
 0x36d   : > { %1330 = vmatmul.bf16.vlgmr.msra.gmra.mxu3 %v1178_v56  ;;  %v5094_v57 = vld [vmem:[#allocation10 + $0x120] sm:$0xff] }
 0x36e   : > { %1511 = vmatpush.bf16.msrb.mxu1 %v5094_v57  ;;  %v5147_v57 = vld [vmem:[#allocation5 + $0xc8] sm:$0xff] }
 0x372   : > { %1512 = vmatpush.bf16.msrb.mxu1 %v5093_v60  ;;  %v5154_v60 = vld [vmem:[#allocation7 + $0xc0] sm:$0xff] }
 0x374   : > { %v1057_v58 = vpop.f32.mrf.mxu3 }
 0x375   : > { %v1061_v59 = vmul.f32 0.17677669, %v1057_v58  ;;  %v5086_v58 = vld [vmem:[#allocation10 + $0xe0] sm:$0xff] }
 0x376   : > { %1572 = vmatpush.bf16.msrb.mxu2 %v5086_v58  ;;  %v5155_v58 = vld [vmem:[#allocation7 + $0xc8] sm:$0xff] }
 0x377   : > { %v1062_v16 = vsel %vm699_vm0, %v1061_v59, -inf }
 0x378   : > { %1063 = vmax.xlane.f32.xlu1 %v1062_v16  ;;  %v5101_v16 = vld [vmem:[#allocation10 + $0x158] sm:$0xff] }
 0x37a   : > { %1573 = vmatpush.bf16.msrb.mxu2 %v5085_v61 }
 0x37c   : > { %v1059_v63 = vpop.f32.mrf.mxu3 }
 0x37d   : > { %v5092_v63 = vld [vmem:[#allocation10 + $0x110] sm:$0xff] }
 0x37e   : > { %1513 = vmatpush.bf16.msrb.mxu1 %v5092_v63  ;;  %1574 = vmatpush.bf16.msrb.mxu2 %v5084_v0 }
 0x3eb   : > { %v1064_v2 = vpop.xlane.xlu1 %1063 }
 0x3ec   : > { %v1065_v3 = vsub.f32 %v1061_v59, %v1064_v2  ;;  %v1270_v4 = vpop.f32.mrf.mxu2  ;;  %v5102_v59 = vld [vmem:[#allocation10 + $0x160] sm:$0xff]  ;;  %v5091_v2 = vld [vmem:[#allocation10 + $0x108] sm:$0xff] }
 0x3ed   : > { %1651 = vmatpush.bf16.msrb.mxu3 %v5102_v59  ;;  %1514 = vmatpush.bf16.msrb.mxu1 %v5091_v2  ;;  %v5146_v59 = vld [vmem:[#allocation5 + $0xc0] sm:$0xff] }
 0x3ee   : > { %v1066_v5 = vmul.f32 1.442695, %v1065_v3  ;;  %v5380_v3 = vld [vmem:[%s6031_s7] ss:$0 sm:$0xff] }
 0x3f0   : > { %5388 = vpow2.f32 %v1066_v5  ;;  %v1331_v6 = vpop.f32.mrf.mxu3 }
 0x3f1   : > { %v5867_v7 = vadd.f32 %v1331_v6, %v1270_v4  ;;  %1652 = vmatpush.bf16.msrb.mxu3 %v5101_v16 }
 0x3f4   : > { %v1272_v8 = vpop.f32.mrf.mxu2 }
 0x3f5   : > { %1653 = vmatpush.bf16.msrb.mxu3 %v5100_v1  ;;  %v5381_v1 = vld [vmem:[%s6031_s7 + $0x1] ss:$0 sm:$0xff] }
 0x3f6   : > { %v5389_v9 = vpop.eup %5388 }
 0x3f7   : > { %v1068_v10 = vsel %vm699_vm0, %v5389_v9, 0.0 }
 0x3f8   : > { %1069 = vadd.xlane.f32.xlu1 %v1068_v10  ;;  %v1333_v11 = vpop.f32.mrf.mxu3  ;;  %v5090_v10 = vld [vmem:[#allocation10 + $0x100] sm:$0xff] }
 0x3f9   : > { %v5083_v11 = vld [vmem:[#allocation10 + $0xc8] sm:$0xff]  ;;  %1515 = vmatpush.bf16.msrb.mxu1 %v5090_v10  ;;  %1654 = vmatpush.bf16.msrb.mxu3 %v5099_v12 }
 0x3fa   : > { %1575 = vmatpush.bf16.msrb.mxu2 %v5083_v11  ;;  %v5137_v11 = vld [vmem:[#allocation8 + $0xb8] sm:$0xff] }
 0x3fd   : > { %1655 = vmatpush.bf16.msrb.mxu3 %v5098_v14 }
 0x3fe   : > { %1576 = vmatpush.bf16.msrb.mxu2 %v5082_v13  ;;  %v5136_v13 = vld [vmem:[#allocation8 + $0xb0] sm:$0xff] }
 0x402   : > { %1891 = vmatpush.bf16.msra.mxu2 %v5129_v15 }
 0x406   : > { %1892 = vmatpush.bf16.msra.mxu2 %v5128_v20  ;;  %v5135_v20 = vld [vmem:[#allocation8 + $0xa8] sm:$0xff] }
 0x46b   : > { %v1070_v24 = vpop.xlane.xlu1 %1069 }
 0x46c   : > { %5390 = vrcp.f32 %v1070_v24  ;;  %v5127_v24 = vld [vmem:[#allocation7 + $0xa8] sm:$0xff] }
 0x46d   : > { %1893 = vmatpush.bf16.msra.mxu2 %v5127_v24  ;;  %v5133_v24 = vld [vmem:[#allocation8 + $0x98] sm:$0xff] }
 0x471   : > { %1894 = vmatpush.bf16.msra.mxu2 %v5126_v31 }
 0x472   : > { %v5391_v27 = vpop.eup %5390 }
 0x473   : > { %v1072_v28 = vmul.f32 %v5391_v27, %v5389_v9 }
 0x475   : > { %v1073_v30 = vpack.c.bf16 %v1072_v28, %v1072_v28  ;;  %1895 = vmatpush.bf16.msra.mxu2 %v5125_v35  ;;  %v5145_v35 = vld [vmem:[#allocation2 + $0xf8] sm:$0xff] }
 0x477   : > { %4052 = vmatmul.msk.bf16.vlgmr.msra.gmra.mxu0 %vm699_vm0, %v1073_v30  ;;  %v5118_v30 = vld [vmem:[#allocation5 + $0xa0] sm:$0xff] }
 0x478   : > { %1735 = vmatpush.bf16.msra.mxu0 %v5113_v29 }
 0x47c   : > { %1736 = vmatpush.bf16.msra.mxu0 %v5112_v32 }
 0x480   : > { %1737 = vmatpush.bf16.msra.mxu0 %v5111_v40  ;;  %v5123_v40 = vld [vmem:[#allocation7 + $0x88] sm:$0xff] }
 0x484   : > { %1738 = vmatpush.bf16.msra.mxu0 %v5110_v41 }
 0x487   : > { %1409 = vmatmul.bf16.vlgmr.msrb.gmra.mxu0 %v1335_v37  ;;  %v5124_v37 = vld [vmem:[#allocation7 + $0x90] sm:$0xff] }
 0x488   : > { %1739 = vmatpush.bf16.msra.mxu0 %v5109_v42  ;;  %1896 = vmatpush.bf16.msra.mxu2 %v5124_v37  ;;  %v5143_v37 = vld [vmem:[#allocation2 + $0xe8] sm:$0xff] }
 0x48c   : > { %1740 = vmatpush.bf16.msra.mxu0 %v5108_v43  ;;  %1897 = vmatpush.bf16.msra.mxu2 %v5123_v40  ;;  %v5114_v43 = vld [vmem:[#allocation5 + $0x80] sm:$0xff]  ;;  %v5141_v40 = vld [vmem:[#allocation2 + $0xd8] sm:$0xff] }
 0x490   : > { %1741 = vmatpush.bf16.msra.mxu0 %v5107_v44  ;;  %v5122_v44 = vld [vmem:[#allocation7 + $0x80] sm:$0xff] }
 0x491   : > { %1898 = vmatpush.bf16.msra.mxu2 %v5122_v44 }
 0x494   : > { %1742 = vmatpush.bf16.msra.mxu0 %v5106_v45  ;;  %v5153_v45 = vld [vmem:[#allocation5 + $0xf8] sm:$0xff] }
 0x4f4   : > { %v1090_v55 = vpop.f32.mrf.mxu0 }
 0x4f5   : > { %v1094_v56 = vpack.c.bf16 %v1090_v55, %v1090_v55  ;;  %v5148_v55 = vld [vmem:[#allocation5 + $0xd0] sm:$0xff] }
 0x4f7   : > { %1168 = vmatmul.bf16.vlgmr.msra.gmra.mxu1 %v1094_v56  ;;  %v5156_v56 = vld [vmem:[#allocation7 + $0xd0] sm:$0xff] }
 0x4fc   : > { %v1092_v62 = vpop.f32.mrf.mxu0 }
 0x504   : > { %v1410_v4 = vpop.f32.mrf.mxu0 }
 0x505   : > { %v1414_v5 = vadd.f32 %v1410_v4, %v5867_v7  ;;  %v5121_v7 = vld [vmem:[#allocation5 + $0xb8] sm:$0xff] }
 0x506   : > { %1813 = vmatpush.bf16.msra.mxu1 %v5121_v7 }
 0x507   : > { %v5877_v6 = vadd.f32 %v5380_v3, %v1414_v5 }
 0x509   : > { %v5881_v8 = vpack.c.bf16 %v5877_v6, %v5877_v6 }
 0x50a   : > { %1814 = vmatpush.bf16.msra.mxu1 %v5120_v19 }
 0x50b   : > { %1743 = vmatmul.bf16.vlgmr.msra.gmra.mxu0 %v5881_v8 }
 0x50c   : > { %v1412_v9 = vpop.f32.mrf.mxu0 }
 0x50e   : > { %1815 = vmatpush.bf16.msra.mxu1 %v5119_v23 }
 0x512   : > { %1816 = vmatpush.bf16.msra.mxu1 %v5118_v30 }
 0x574   : > { %v1169_v21 = vpop.f32.mrf.mxu1 }
 0x575   : > { %v1173_v22 = vadd.f32 %v1169_v21, %v5834_v17  ;;  %v5117_v17 = vld [vmem:[#allocation5 + $0x98] sm:$0xff] }
 0x576   : > { %1817 = vmatpush.bf16.msra.mxu1 %v5117_v17 }
 0x577   : > { %v1420_v25 = vrot.slane %v1173_v22, 7  ;;  %v1422_v26 = vrot.slane %v1173_v22, 1  ;;  %v1442_v27 = vpack.c.bf16 %v1173_v22, %v1173_v22 }
 0x579   : > { %v1421_v28 = vmul.f32 %v5859_v52, %v1420_v25  ;;  %v1423_v29 = vmul.f32 %v5853_v39, %v1422_v26  ;;  %1516 = vmatmul.bf16.vlgmr.msrb.gmra.mxu1 %v1442_v27  ;;  %v5132_v25 = vld [vmem:[#allocation8 + $0x90] sm:$0xff] }
 0x57a   : > { %1818 = vmatpush.bf16.msra.mxu1 %v5116_v36  ;;  %v5144_v36 = vld [vmem:[#allocation2 + $0xf0] sm:$0xff] }
 0x57b   : > { %v1424_v32 = vpack.c.bf16 %v1421_v28, %v1421_v28  ;;  %v1582_v33 = vpack.c.bf16 %v1423_v29, %v1423_v29  ;;  %v5131_v28 = vld [vmem:[#allocation8 + $0x88] sm:$0xff]  ;;  %v5130_v29 = vld [vmem:[#allocation8 + $0x80] sm:$0xff] }
 0x57c   : > { %v1171_v34 = vpop.f32.mrf.mxu1 }
 0x57d   : > { %1577 = vmatmul.bf16.vlgmr.msrb.gmra.mxu2 %v1424_v32  ;;  %1656 = vmatmul.bf16.vlgmr.msrb.gmra.mxu3 %v1582_v33 }
 0x57e   : > { %1819 = vmatpush.bf16.msra.mxu1 %v5115_v38  ;;  %2253 = vmatpush.bf16.msrb.mxu2 %v5161_v46  ;;  %v5142_v38 = vld [vmem:[#allocation2 + $0xe0] sm:$0xff]  ;;  %v5140_v46 = vld [vmem:[#allocation2 + $0xd0] sm:$0xff] }
 0x582   : > { %1820 = vmatpush.bf16.msra.mxu1 %v5114_v43  ;;  %2254 = vmatpush.bf16.msrb.mxu2 %v5160_v48  ;;  %v5138_v48 = vld [vmem:[#allocation2 + $0xc0] sm:$0xff] }
 0x586   : > { %2175 = vmatpush.bf16.msrb.mxu1 %v5153_v45  ;;  %2255 = vmatpush.bf16.msrb.mxu2 %v5159_v50 }
 0x588   : > { %v5887_v41 = vpop.f32.mrf.mxu0 }
 0x589   : > { %v1904_v15 = vpack.c.bf16 %v5887_v41, %v5887_v41 }
 0x58a   : > { %2176 = vmatpush.bf16.msrb.mxu1 %v5152_v47  ;;  %2256 = vmatpush.bf16.msrb.mxu2 %v5158_v51  ;;  %v5139_v47 = vld [vmem:[#allocation2 + $0xc8] sm:$0xff] }
 0x58e   : > { %2177 = vmatpush.bf16.msrb.mxu1 %v5151_v49  ;;  %2257 = vmatpush.bf16.msrb.mxu2 %v5157_v54 }
 0x590   : > { %v1746_v42 = vpop.f32.mrf.mxu0 }
 0x592   : > { %2178 = vmatpush.bf16.msrb.mxu1 %v5150_v18  ;;  %2258 = vmatpush.bf16.msrb.mxu2 %v5156_v56  ;;  %v5184_v56 = vld [vmem:[#allocation10 + $0x1f0] sm:$0xff] }
 0x596   : > { %2179 = vmatpush.bf16.msrb.mxu1 %v5149_v53  ;;  %2259 = vmatpush.bf16.msrb.mxu2 %v5155_v58 }
 0x59a   : > { %2180 = vmatpush.bf16.msrb.mxu1 %v5148_v55  ;;  %2260 = vmatpush.bf16.msrb.mxu2 %v5154_v60  ;;  %v5185_v55 = vld [vmem:[#allocation10 + $0x1f8] sm:$0xff] }
 0x59e   : > { %2181 = vmatpush.bf16.msrb.mxu1 %v5147_v57  ;;  %v5183_v57 = vld [vmem:[#allocation10 + $0x1e8] sm:$0xff] }
 0x5a2   : > { %2182 = vmatpush.bf16.msrb.mxu1 %v5146_v59  ;;  %v5177_v59 = vld [vmem:[#allocation10 + $0x1b8] sm:$0xff] }
 0x5f6   : > { %v1517_v61 = vpop.f32.mrf.mxu1 }
 0x5fe   : > { %v1519_v16 = vpop.f32.mrf.mxu1 }
 0x5ff   : > { %v5176_v16 = vld [vmem:[#allocation10 + $0x1b0] sm:$0xff] }
 0x600   : > { %v1578_v62 = vpop.f32.mrf.mxu2  ;;  %v1657_v63 = vpop.f32.mrf.mxu3 }
 0x601   : > { %v1579_v0 = vadd.f32 %v1578_v62, %v1517_v61  ;;  %v5182_v61 = vld [vmem:[#allocation10 + $0x1e0] sm:$0xff]  ;;  %v5181_v62 = vld [vmem:[#allocation10 + $0x1d8] sm:$0xff] }
 0x603   : > { %v1661_v2 = vadd.f32 %v1657_v63, %v1579_v0  ;;  %v5175_v0 = vld [vmem:[#allocation10 + $0x1a8] sm:$0xff] }
 0x605   : > { %v5892_v3 = vadd.f32 %v5381_v1, %v1661_v2  ;;  %v5180_v1 = vld [vmem:[#allocation10 + $0x1d0] sm:$0xff]  ;;  %v5174_v2 = vld [vmem:[#allocation10 + $0x1a0] sm:$0xff] }
 0x607   : > { %v5896_v4 = vpack.c.bf16 %v5892_v3, %v5892_v3 }
 0x608   : > { %v1580_v5 = vpop.f32.mrf.mxu2  ;;  %v1659_v9 = vpop.f32.mrf.mxu3 }
 0x609   : > { %1821 = vmatmul.bf16.vlgmr.msra.gmra.mxu1 %v5896_v4  ;;  %1899 = vmatmul.bf16.vlgmr.msra.gmra.mxu2 %v5896_v4  ;;  %v5173_v9 = vld [vmem:[#allocation10 + $0x198] sm:$0xff] }
 0x60a   : > { %2482 = vmatpush.bf16.msra.mxu2 %v5185_v55  ;;  %v5224_v55 = vld [vmem:[#allocation2 + $0x130] sm:$0xff] }
 0x60e   : > { %2483 = vmatpush.bf16.msra.mxu2 %v5184_v56  ;;  %v5164_v56 = vld [vmem:[#allocation8 + $0xd0] sm:$0xff] }
 0x612   : > { %2484 = vmatpush.bf16.msra.mxu2 %v5183_v57 }
 0x616   : > { %2485 = vmatpush.bf16.msra.mxu2 %v5182_v61  ;;  %v5162_v61 = vld [vmem:[#allocation8 + $0xc0] sm:$0xff] }
 0x619   : > { %2183 = vmatmul.bf16.vlgmr.msrb.gmra.mxu1 %v5881_v8  ;;  %2261 = vmatmul.bf16.vlgmr.msrb.gmra.mxu2 %v5881_v8  ;;  %v5134_v8 = vld [vmem:[#allocation8 + $0xa0] sm:$0xff] }
 0x61a   : > { %2486 = vmatpush.bf16.msra.mxu2 %v5181_v62  ;;  %v5222_v62 = vld [vmem:[#allocation2 + $0x120] sm:$0xff] }
 0x61e   : > { %2487 = vmatpush.bf16.msra.mxu2 %v5180_v1  ;;  %v5219_v1 = vld [vmem:[#allocation2 + $0x108] sm:$0xff] }
 0x686   : > { %v1822_v10 = vpop.f32.mrf.mxu1 }
 0x687   : > { %v1905_v12 = vpack.c.bf16 %v1822_v10, %v1822_v10 }
 0x689   : > { %1913 = vmatpush.bf16.xpose.msra.mxu3 %v1905_v12 }
 0x68c   : > { %v1900_v14 = vpop.f32.mrf.mxu2 }
 0x68d   : > { %v1932_v7 = vpack.c.bf16 %v1900_v14, %v1900_v14  ;;  %v5171_v14 = vld [vmem:[#allocation10 + $0x188] sm:$0xff] }
 0x68e   : > { %v1824_v19 = vpop.f32.mrf.mxu1 }
 0x68f   : > { %v1937_v21 = vsel %vm716_vm1, %v1932_v7, 0  ;;  %v5170_v7 = vld [vmem:[#allocation10 + $0x180] sm:$0xff] }
 0x690   : > { %1914 = vmatmul.bf16.vlgmr.msra.gmra.mxu3 %v1904_v15  ;;  %1946 = vmatpush.bf16.msrb.mxu0 %v1937_v21 }
 0x691   : > { %2018 = vmatpush.bf16.msrb.mxu3 %v5137_v11  ;;  %v5172_v11 = vld [vmem:[#allocation10 + $0x190] sm:$0xff] }
 0x694   : > { %v1902_v22 = vpop.f32.mrf.mxu2  ;;  %2097 = vmatpush.bf16.msra.mxu0 %v5145_v35 }
 0x695   : > { %2019 = vmatpush.bf16.msrb.mxu3 %v5136_v13  ;;  %v5178_v13 = vld [vmem:[#allocation10 + $0x1c0] sm:$0xff] }
 0x696   : > { %v2184_v23 = vpop.f32.mrf.mxu1 }
 0x697   : > { %v2267_v31 = vpack.c.bf16 %v2184_v23, %v2184_v23 }
 0x698   : > { %2098 = vmatpush.bf16.msra.mxu0 %v5144_v36 }
 0x699   : > { %2020 = vmatpush.bf16.msrb.mxu3 %v5135_v20 }
 0x69c   : > { %v2262_v26 = vpop.f32.mrf.mxu2  ;;  %2099 = vmatpush.bf16.msra.mxu0 %v5143_v37  ;;  %v5192_v37 = vld [vmem:[#allocation10 + $0x230] sm:$0xff] }
 0x69d   : > { %2021 = vmatpush.bf16.msrb.mxu3 %v5134_v8  ;;  %v2294_v18 = vpack.c.bf16 %v2262_v26, %v2262_v26 }
 0x69e   : > { %v2186_v27 = vpop.f32.mrf.mxu1 }
 0x69f   : > { %v2299_v54 = vsel %vm716_vm1, %v2294_v18, 0 }
 0x6a0   : > { %2100 = vmatpush.bf16.msra.mxu0 %v5142_v38  ;;  %v5191_v38 = vld [vmem:[#allocation10 + $0x228] sm:$0xff] }
 0x6a1   : > { %2022 = vmatpush.bf16.msrb.mxu3 %v5133_v24 }
 0x6a4   : > { %v2264_v30 = vpop.f32.mrf.mxu2  ;;  %2101 = vmatpush.bf16.msra.mxu0 %v5141_v40  ;;  %v5190_v40 = vld [vmem:[#allocation10 + $0x220] sm:$0xff] }
 0x6a5   : > { %2023 = vmatpush.bf16.msrb.mxu3 %v5132_v25 }
 0x6a8   : > { %2102 = vmatpush.bf16.msra.mxu0 %v5140_v46  ;;  %v5168_v46 = vld [vmem:[#allocation8 + $0xf0] sm:$0xff] }
 0x6a9   : > { %2024 = vmatpush.bf16.msrb.mxu3 %v5131_v28  ;;  %v5193_v28 = vld [vmem:[#allocation10 + $0x238] sm:$0xff] }
 0x6ac   : > { %2103 = vmatpush.bf16.msra.mxu0 %v5139_v47 }
 0x6ad   : > { %2025 = vmatpush.bf16.msrb.mxu3 %v5130_v29 }
 0x6b0   : > { %2104 = vmatpush.bf16.msra.mxu0 %v5138_v48  ;;  %v5167_v48 = vld [vmem:[#allocation8 + $0xe8] sm:$0xff] }
 0x6b1   : > { %2275 = vmatpush.bf16.xpose.msra.mxu3 %v2267_v31 }
 0x713   : > { %v1915_v32 = vpop.f32.mrf.mxu3 }
 0x714   : > { %v1919_v33 = vmul.f32 0.17677669, %v1915_v32 }
 0x716   : > { %v1920_v34 = vsel %vm699_vm0, %v1919_v33, -inf }
 0x717   : > { %1921 = vmax.xlane.f32.xlu2 %v1920_v34 }
 0x71b   : > { %v1917_v17 = vpop.f32.mrf.mxu3 }
 0x78a   : > { %v1922_v41 = vpop.xlane.xlu2 %1921 }
 0x78b   : > { %v1923_v42 = vsub.f32 %v1919_v33, %v1922_v41  ;;  %v5189_v41 = vld [vmem:[#allocation10 + $0x218] sm:$0xff] }
 0x78d   : > { %v1924_v43 = vmul.f32 1.442695, %v1923_v42  ;;  %v5188_v42 = vld [vmem:[#allocation10 + $0x210] sm:$0xff] }
 0x78f   : > { %5392 = vpow2.f32 %v1924_v43  ;;  %v5187_v43 = vld [vmem:[#allocation10 + $0x208] sm:$0xff] }
 0x795   : > { %v5393_v44 = vpop.eup %5392 }
 0x796   : > { %v1926_v45 = vsel %vm699_vm0, %v5393_v44, 0.0 }
 0x797   : > { %1927 = vadd.xlane.f32.xlu2 %v1926_v45  ;;  %v5169_v45 = vld [vmem:[#allocation8 + $0xf8] sm:$0xff] }
 0x798   : > { %2380 = vmatpush.bf16.msra.mxu1 %v5169_v45 }
 0x79c   : > { %2381 = vmatpush.bf16.msra.mxu1 %v5168_v46  ;;  %v5231_v46 = vld [vmem:[#allocation5 + $0x128] sm:$0xff] }
 0x7a0   : > { %2382 = vmatpush.bf16.msra.mxu1 %v5167_v48 }
 0x80a   : > { %v1928_v49 = vpop.xlane.xlu2 %1927 }
 0x80b   : > { %5394 = vrcp.f32 %v1928_v49  ;;  %v5166_v49 = vld [vmem:[#allocation8 + $0xe0] sm:$0xff] }
 0x80c   : > { %2383 = vmatpush.bf16.msra.mxu1 %v5166_v49 }
 0x811   : > { %v5395_v50 = vpop.eup %5394 }
 0x812   : > { %v1930_v51 = vmul.f32 %v5395_v50, %v5393_v44  ;;  %v5186_v44 = vld [vmem:[#allocation10 + $0x200] sm:$0xff] }
 0x814   : > { %v1931_v53 = vpack.c.bf16 %v1930_v51, %v1930_v51  ;;  %v5225_v51 = vld [vmem:[#allocation2 + $0x138] sm:$0xff] }
 0x816   : > { %4374 = vmatmul.msk.bf16.vlgmr.msrb.gmra.mxu0 %vm699_vm0, %v1931_v53 }
 0x817   : > { %2308 = vmatpush.bf16.msrb.mxu0 %v2299_v54  ;;  %v5165_v54 = vld [vmem:[#allocation8 + $0xd8] sm:$0xff] }
 0x818   : > { %2384 = vmatpush.bf16.msra.mxu1 %v5165_v54  ;;  %v5238_v54 = vld [vmem:[#allocation7 + $0x120] sm:$0xff] }
 0x81c   : > { %2385 = vmatpush.bf16.msra.mxu1 %v5164_v56 }
 0x826   : > { %2105 = vmatmul.bf16.vlgmr.msra.gmra.mxu0 %v5896_v4  ;;  %v5179_v4 = vld [vmem:[#allocation10 + $0x1c8] sm:$0xff] }
 0x827   : > { %2488 = vmatpush.bf16.msra.mxu2 %v5179_v4  ;;  %2622 = vmatpush.bf16.msra.mxu0 %v5193_v28  ;;  %v5209_v4 = vld [vmem:[#allocation10 + $0x2b8] sm:$0xff]  ;;  %v5212_v28 = vld [vmem:[#allocation10 + $0x2d0] sm:$0xff] }
 0x82b   : > { %2489 = vmatpush.bf16.msra.mxu2 %v5178_v13  ;;  %2623 = vmatpush.bf16.msra.mxu0 %v5192_v37  ;;  %v5207_v13 = vld [vmem:[#allocation10 + $0x2a8] sm:$0xff] }
 0x82c   : > { %v5211_v37 = vld [vmem:[#allocation10 + $0x2c8] sm:$0xff] }
 0x82f   : > { %2624 = vmatpush.bf16.msra.mxu0 %v5191_v38  ;;  %v5194_v38 = vld [vmem:[#allocation10 + $0x240] sm:$0xff] }
 0x833   : > { %2625 = vmatpush.bf16.msra.mxu0 %v5190_v40  ;;  %v5210_v40 = vld [vmem:[#allocation10 + $0x2c0] sm:$0xff] }
 0x837   : > { %2626 = vmatpush.bf16.msra.mxu0 %v5189_v41  ;;  %v5241_v41 = vld [vmem:[#allocation7 + $0x138] sm:$0xff] }
 0x83b   : > { %2627 = vmatpush.bf16.msra.mxu0 %v5188_v42  ;;  %v5232_v42 = vld [vmem:[#allocation5 + $0x130] sm:$0xff] }
 0x83f   : > { %2628 = vmatpush.bf16.msra.mxu0 %v5187_v43  ;;  %v5240_v43 = vld [vmem:[#allocation7 + $0x130] sm:$0xff] }
 0x843   : > { %2629 = vmatpush.bf16.msra.mxu0 %v5186_v44 }
 0x893   : > { %v1948_v58 = vpop.f32.mrf.mxu0 }
 0x894   : > { %v1952_v60 = vpack.c.bf16 %v1948_v58, %v1948_v58  ;;  %v5163_v58 = vld [vmem:[#allocation8 + $0xc8] sm:$0xff] }
 0x895   : > { %2386 = vmatpush.bf16.msra.mxu1 %v5163_v58  ;;  %v5237_v58 = vld [vmem:[#allocation7 + $0x118] sm:$0xff] }
 0x896   : > { %2026 = vmatmul.bf16.vlgmr.msrb.gmra.mxu3 %v1952_v60 }
 0x897   : > { %2543 = vmatpush.bf16.msrb.mxu3 %v5177_v59 }
 0x899   : > { %2387 = vmatpush.bf16.msra.mxu1 %v5162_v61 }
 0x89b   : > { %v1950_v63 = vpop.f32.mrf.mxu0  ;;  %2544 = vmatpush.bf16.msrb.mxu3 %v5176_v16  ;;  %v5223_v16 = vld [vmem:[#allocation2 + $0x128] sm:$0xff] }
 0x89c   : > { %v5221_v63 = vld [vmem:[#allocation2 + $0x118] sm:$0xff] }
 0x89d   : > { %2730 = vmatpush.bf16.msrb.mxu1 %v5209_v4  ;;  %v5272_v4 = vld [vmem:[#allocation7 + $0x170] sm:$0xff] }
 0x89f   : > { %2545 = vmatpush.bf16.msrb.mxu3 %v5175_v0  ;;  %v5220_v0 = vld [vmem:[#allocation2 + $0x110] sm:$0xff] }
 0x8a3   : > { %v2106_v5 = vpop.f32.mrf.mxu0  ;;  %2546 = vmatpush.bf16.msrb.mxu3 %v5174_v2  ;;  %v5218_v2 = vld [vmem:[#allocation2 + $0x100] sm:$0xff] }
 0x8a4   : > { %v2266_v10 = vpack.c.bf16 %v2106_v5, %v2106_v5  ;;  %v5201_v5 = vld [vmem:[#allocation10 + $0x278] sm:$0xff] }
 0x8a5   : > { %2791 = vmatpush.bf16.msrb.mxu2 %v5201_v5  ;;  %v5263_v5 = vld [vmem:[#allocation5 + $0x168] sm:$0xff] }
 0x8a6   : > { %2276 = vmatmul.bf16.vlgmr.msra.gmra.mxu3 %v2266_v10  ;;  %v5208_v10 = vld [vmem:[#allocation10 + $0x2b0] sm:$0xff] }
 0x8a7   : > { %2547 = vmatpush.bf16.msrb.mxu3 %v5173_v9  ;;  %v5217_v9 = vld [vmem:[#allocation10 + $0x2f8] sm:$0xff]  ;;  %2731 = vmatpush.bf16.msrb.mxu1 %v5208_v10  ;;  %v5262_v10 = vld [vmem:[#allocation5 + $0x160] sm:$0xff] }
 0x8ab   : > { %v2108_v12 = vpop.f32.mrf.mxu0  ;;  %2548 = vmatpush.bf16.msrb.mxu3 %v5172_v11  ;;  %v5200_v11 = vld [vmem:[#allocation10 + $0x270] sm:$0xff]  ;;  %2732 = vmatpush.bf16.msrb.mxu1 %v5207_v13  ;;  %v5269_v13 = vld [vmem:[#allocation7 + $0x158] sm:$0xff] }
 0x8ac   : > { %v5216_v12 = vld [vmem:[#allocation10 + $0x2f0] sm:$0xff]  ;;  %2792 = vmatpush.bf16.msrb.mxu2 %v5200_v11  ;;  %v5270_v11 = vld [vmem:[#allocation7 + $0x160] sm:$0xff] }
 0x8af   : > { %2549 = vmatpush.bf16.msrb.mxu3 %v5171_v14  ;;  %v5199_v14 = vld [vmem:[#allocation10 + $0x268] sm:$0xff] }
 0x8b0   : > { %2793 = vmatpush.bf16.msrb.mxu2 %v5199_v14  ;;  %v5260_v14 = vld [vmem:[#allocation5 + $0x150] sm:$0xff] }
 0x8b3   : > { %2550 = vmatpush.bf16.msrb.mxu3 %v5170_v7  ;;  %v5215_v7 = vld [vmem:[#allocation10 + $0x2e8] sm:$0xff] }
 0x8b7   : > { %2870 = vmatpush.bf16.msra.mxu3 %v5217_v9  ;;  %v5271_v9 = vld [vmem:[#allocation7 + $0x168] sm:$0xff] }
 0x8bb   : > { %2871 = vmatpush.bf16.msra.mxu3 %v5216_v12  ;;  %v5261_v12 = vld [vmem:[#allocation5 + $0x158] sm:$0xff] }
 0x8bf   : > { %2872 = vmatpush.bf16.msra.mxu3 %v5215_v7  ;;  %v5268_v7 = vld [vmem:[#allocation7 + $0x150] sm:$0xff] }
 0x919   : > { %v2027_v15 = vpop.f32.mrf.mxu3 }
 0x91a   : > { %v5911_v19 = vadd.f32 %v2027_v15, %v5877_v6 }
 0x91c   : > { %v2394_v20 = vrot.slane %v5911_v19, 7  ;;  %v2416_v21 = vpack.c.bf16 %v5911_v19, %v5911_v19  ;;  %v2396_v57 = vrot.slane %v5911_v19, 1 }
 0x91e   : > { %v2395_v8 = vmul.f32 %v5859_v52, %v2394_v20  ;;  %2490 = vmatmul.bf16.vlgmr.msra.gmra.mxu2 %v2416_v21  ;;  %v2397_v59 = vmul.f32 %v5853_v39, %v2396_v57  ;;  %v5206_v20 = vld [vmem:[#allocation10 + $0x2a0] sm:$0xff] }
 0x91f   : > { %v5198_v21 = vld [vmem:[#allocation10 + $0x260] sm:$0xff]  ;;  %2733 = vmatpush.bf16.msrb.mxu1 %v5206_v20 }
 0x920   : > { %v2398_v22 = vpack.c.bf16 %v2395_v8, %v2395_v8  ;;  %v2556_v60 = vpack.c.bf16 %v2397_v59, %v2397_v59  ;;  %v5214_v8 = vld [vmem:[#allocation10 + $0x2e0] sm:$0xff]  ;;  %2794 = vmatpush.bf16.msrb.mxu2 %v5198_v21  ;;  %v5228_v59 = vld [vmem:[#allocation5 + $0x110] sm:$0xff] }
 0x921   : > { %v2029_v23 = vpop.f32.mrf.mxu3  ;;  %2873 = vmatpush.bf16.msra.mxu3 %v5214_v8  ;;  %v5258_v20 = vld [vmem:[#allocation5 + $0x140] sm:$0xff] }
 0x922   : > { %2551 = vmatmul.bf16.vlgmr.msrb.gmra.mxu3 %v2398_v22  ;;  %v5205_v22 = vld [vmem:[#allocation10 + $0x298] sm:$0xff]  ;;  %v5266_v21 = vld [vmem:[#allocation7 + $0x140] sm:$0xff] }
 0x923   : > { %v5197_v23 = vld [vmem:[#allocation10 + $0x258] sm:$0xff]  ;;  %2734 = vmatpush.bf16.msrb.mxu1 %v5205_v22 }
 0x924   : > { %2795 = vmatpush.bf16.msrb.mxu2 %v5197_v23 }
 0x929   : > { %v2277_v24 = vpop.f32.mrf.mxu3 }
 0x92a   : > { %v2281_v25 = vmul.f32 0.17677669, %v2277_v24  ;;  %v5213_v24 = vld [vmem:[#allocation10 + $0x2d8] sm:$0xff] }
 0x92b   : > { %2874 = vmatpush.bf16.msra.mxu3 %v5213_v24 }
 0x92c   : > { %v2282_v26 = vsel %vm699_vm0, %v2281_v25, -inf }
 0x92d   : > { %2283 = vmax.xlane.f32.xlu0 %v2282_v26  ;;  %v5204_v26 = vld [vmem:[#allocation10 + $0x290] sm:$0xff] }
 0x92e   : > { %2735 = vmatpush.bf16.msrb.mxu1 %v5204_v26  ;;  %v5383_v26 = vld [vmem:[%s6031_s7 + $0x3] ss:$0 sm:$0xff] }
 0x92f   : > { %2875 = vmatpush.bf16.msra.mxu3 %v5212_v28 }
 0x931   : > { %v2279_v27 = vpop.f32.mrf.mxu3 }
 0x932   : > { %v5196_v27 = vld [vmem:[#allocation10 + $0x250] sm:$0xff] }
 0x933   : > { %2796 = vmatpush.bf16.msrb.mxu2 %v5196_v27  ;;  %2876 = vmatpush.bf16.msra.mxu3 %v5211_v37 }
 0x937   : > { %2877 = vmatpush.bf16.msra.mxu3 %v5210_v40 }
 0x9a0   : > { %v2284_v6 = vpop.xlane.xlu0 %2283 }
 0x9a1   : > { %v2285_v29 = vsub.f32 %v2281_v25, %v2284_v6  ;;  %v2491_v30 = vpop.f32.mrf.mxu2  ;;  %v5203_v6 = vld [vmem:[#allocation10 + $0x288] sm:$0xff] }
 0x9a2   : > { %2736 = vmatpush.bf16.msrb.mxu1 %v5203_v6 }
 0x9a3   : > { %v2286_v31 = vmul.f32 1.442695, %v2285_v29  ;;  %v5382_v29 = vld [vmem:[%s6031_s7 + $0x2] ss:$0 sm:$0xff] }
 0x9a5   : > { %5396 = vpow2.f32 %v2286_v31  ;;  %v2552_v32 = vpop.f32.mrf.mxu3 }
 0x9a6   : > { %v5918_v33 = vadd.f32 %v2552_v32, %v2491_v30 }
 0x9a9   : > { %v2493_v34 = vpop.f32.mrf.mxu2 }
 0x9ab   : > { %v5397_v17 = vpop.eup %5396 }
 0x9ac   : > { %v2288_v35 = vsel %vm699_vm0, %v5397_v17, 0.0 }
 0x9ad   : > { %2289 = vadd.xlane.f32.xlu1 %v2288_v35  ;;  %v2554_v36 = vpop.f32.mrf.mxu3  ;;  %v5202_v35 = vld [vmem:[#allocation10 + $0x280] sm:$0xff] }
 0x9ae   : > { %v5195_v36 = vld [vmem:[#allocation10 + $0x248] sm:$0xff]  ;;  %2737 = vmatpush.bf16.msrb.mxu1 %v5202_v35 }
 0x9af   : > { %2797 = vmatpush.bf16.msrb.mxu2 %v5195_v36  ;;  %v5248_v36 = vld [vmem:[#allocation8 + $0x130] sm:$0xff] }
 0x9b3   : > { %2798 = vmatpush.bf16.msrb.mxu2 %v5194_v38 }
 0x9b7   : > { %3113 = vmatpush.bf16.msra.mxu2 %v5241_v41  ;;  %v5247_v41 = vld [vmem:[#allocation8 + $0x128] sm:$0xff] }
 0x9bb   : > { %3114 = vmatpush.bf16.msra.mxu2 %v5240_v43 }
 0xa20   : > { %v2290_v47 = vpop.xlane.xlu1 %2289 }
 0xa21   : > { %5398 = vrcp.f32 %v2290_v47  ;;  %v5239_v47 = vld [vmem:[#allocation7 + $0x128] sm:$0xff] }
 0xa22   : > { %3115 = vmatpush.bf16.msra.mxu2 %v5239_v47 }
 0xa26   : > { %3116 = vmatpush.bf16.msra.mxu2 %v5238_v54 }
 0xa27   : > { %v5399_v50 = vpop.eup %5398 }
 0xa28   : > { %v2292_v18 = vmul.f32 %v5399_v50, %v5397_v17 }
 0xa2a   : > { %v2293_v53 = vpack.c.bf16 %v2292_v18, %v2292_v18  ;;  %3117 = vmatpush.bf16.msra.mxu2 %v5237_v58  ;;  %v5255_v58 = vld [vmem:[#allocation2 + $0x168] sm:$0xff] }
 0xa2c   : > { %4503 = vmatmul.msk.bf16.vlgmr.msrb.gmra.mxu0 %vm699_vm0, %v2293_v53  ;;  %v5230_v53 = vld [vmem:[#allocation5 + $0x120] sm:$0xff] }
 0xa2d   : > { %2957 = vmatpush.bf16.msrb.mxu0 %v5225_v51 }
 0xa31   : > { %2958 = vmatpush.bf16.msrb.mxu0 %v5224_v55 }
 0xa35   : > { %2959 = vmatpush.bf16.msrb.mxu0 %v5223_v16 }
 0xa39   : > { %2960 = vmatpush.bf16.msrb.mxu0 %v5222_v62  ;;  %v5226_v62 = vld [vmem:[#allocation5 + $0x100] sm:$0xff] }
 0xa3c   : > { %2630 = vmatmul.bf16.vlgmr.msra.gmra.mxu0 %v2556_v60  ;;  %v5235_v60 = vld [vmem:[#allocation7 + $0x108] sm:$0xff] }
 0xa3d   : > { %2961 = vmatpush.bf16.msrb.mxu0 %v5221_v63  ;;  %v5234_v63 = vld [vmem:[#allocation7 + $0x100] sm:$0xff] }
 0xa41   : > { %2962 = vmatpush.bf16.msrb.mxu0 %v5220_v0  ;;  %v5265_v0 = vld [vmem:[#allocation5 + $0x178] sm:$0xff] }
 0xa45   : > { %2963 = vmatpush.bf16.msrb.mxu0 %v5219_v1  ;;  %v5273_v1 = vld [vmem:[#allocation7 + $0x178] sm:$0xff] }
 0xa49   : > { %2964 = vmatpush.bf16.msrb.mxu0 %v5218_v2  ;;  %v5264_v2 = vld [vmem:[#allocation5 + $0x170] sm:$0xff] }
 0xaa9   : > { %v2310_v15 = vpop.f32.mrf.mxu0 }
 0xaaa   : > { %v2314_v19 = vpack.c.bf16 %v2310_v15, %v2310_v15  ;;  %v5259_v15 = vld [vmem:[#allocation5 + $0x148] sm:$0xff] }
 0xaac   : > { %2388 = vmatmul.bf16.vlgmr.msra.gmra.mxu1 %v2314_v19  ;;  %v5267_v19 = vld [vmem:[#allocation7 + $0x148] sm:$0xff] }
 0xab1   : > { %v2312_v25 = vpop.f32.mrf.mxu0 }
 0xab9   : > { %v2631_v30 = vpop.f32.mrf.mxu0 }
 0xaba   : > { %v2635_v31 = vadd.f32 %v2631_v30, %v5918_v33  ;;  %v5233_v33 = vld [vmem:[#allocation5 + $0x138] sm:$0xff] }
 0xabb   : > { %3035 = vmatpush.bf16.msra.mxu1 %v5233_v33 }
 0xabc   : > { %v5928_v32 = vadd.f32 %v5382_v29, %v2635_v31 }
 0xabe   : > { %v5932_v34 = vpack.c.bf16 %v5928_v32, %v5928_v32 }
 0xabf   : > { %3036 = vmatpush.bf16.msra.mxu1 %v5232_v42 }
 0xac0   : > { %2965 = vmatmul.bf16.vlgmr.msrb.gmra.mxu0 %v5932_v34 }
 0xac1   : > { %v2633_v17 = vpop.f32.mrf.mxu0 }
 0xac2   : > { %v5249_v17 = vld [vmem:[#allocation8 + $0x138] sm:$0xff] }
 0xac3   : > { %3037 = vmatpush.bf16.msra.mxu1 %v5231_v46  ;;  %v5244_v46 = vld [vmem:[#allocation8 + $0x110] sm:$0xff] }
 0xac7   : > { %3038 = vmatpush.bf16.msra.mxu1 %v5230_v53 }
 0xb29   : > { %v2389_v44 = vpop.f32.mrf.mxu1 }
 0xb2a   : > { %v2393_v45 = vadd.f32 %v2389_v44, %v5892_v3  ;;  %v5229_v3 = vld [vmem:[#allocation5 + $0x118] sm:$0xff] }
 0xb2b   : > { %3039 = vmatpush.bf16.msra.mxu1 %v5229_v3  ;;  %v5256_v3 = vld [vmem:[#allocation2 + $0x170] sm:$0xff] }
 0xb2c   : > { %v2642_v48 = vrot.slane %v2393_v45, 7  ;;  %v2644_v49 = vrot.slane %v2393_v45, 1  ;;  %v2664_v50 = vpack.c.bf16 %v2393_v45, %v2393_v45  ;;  %v5245_v45 = vld [vmem:[#allocation8 + $0x118] sm:$0xff] }
 0xb2e   : > { %v2643_v18 = vmul.f32 %v5859_v52, %v2642_v48  ;;  %v2645_v51 = vmul.f32 %v5853_v39, %v2644_v49  ;;  %2738 = vmatmul.bf16.vlgmr.msrb.gmra.mxu1 %v2664_v50  ;;  %v5236_v52 = vld [vmem:[#allocation7 + $0x110] sm:$0xff]  ;;  %v5227_v39 = vld [vmem:[#allocation5 + $0x108] sm:$0xff]  ;;  %v5242_v50 = vld [vmem:[#allocation8 + $0x100] sm:$0xff] }
 0xb2f   : > { %3040 = vmatpush.bf16.msra.mxu1 %v5228_v59  ;;  %3118 = vmatpush.bf16.msra.mxu2 %v5236_v52  ;;  %v5243_v49 = vld [vmem:[#allocation8 + $0x108] sm:$0xff]  ;;  %v5254_v59 = vld [vmem:[#allocation2 + $0x160] sm:$0xff]  ;;  %v5253_v52 = vld [vmem:[#allocation2 + $0x158] sm:$0xff] }
 0xb30   : > { %v2646_v55 = vpack.c.bf16 %v2643_v18, %v2643_v18  ;;  %v2804_v56 = vpack.c.bf16 %v2645_v51, %v2645_v51 }
 0xb31   : > { %v2391_v57 = vpop.f32.mrf.mxu1 }
 0xb32   : > { %2799 = vmatmul.bf16.vlgmr.msrb.gmra.mxu2 %v2646_v55  ;;  %2878 = vmatmul.bf16.vlgmr.msra.gmra.mxu3 %v2804_v56  ;;  %v5257_v57 = vld [vmem:[#allocation2 + $0x178] sm:$0xff] }
 0xb33   : > { %3041 = vmatpush.bf16.msra.mxu1 %v5227_v39  ;;  %3119 = vmatpush.bf16.msra.mxu2 %v5235_v60 }
 0xb37   : > { %3042 = vmatpush.bf16.msra.mxu1 %v5226_v62  ;;  %3120 = vmatpush.bf16.msra.mxu2 %v5234_v63  ;;  %v5252_v63 = vld [vmem:[#allocation2 + $0x150] sm:$0xff] }
 0xb3b   : > { %3397 = vmatpush.bf16.msrb.mxu1 %v5265_v0  ;;  %3475 = vmatpush.bf16.msrb.mxu2 %v5273_v1  ;;  %v5251_v0 = vld [vmem:[#allocation2 + $0x148] sm:$0xff]  ;;  %v5250_v1 = vld [vmem:[#allocation2 + $0x140] sm:$0xff] }
 0xb3d   : > { %v5938_v61 = vpop.f32.mrf.mxu0 }
 0xb3e   : > { %v3126_v40 = vpack.c.bf16 %v5938_v61, %v5938_v61 }
 0xb3f   : > { %3398 = vmatpush.bf16.msrb.mxu1 %v5264_v2  ;;  %3476 = vmatpush.bf16.msrb.mxu2 %v5272_v4 }
 0xb43   : > { %3399 = vmatpush.bf16.msrb.mxu1 %v5263_v5  ;;  %3477 = vmatpush.bf16.msrb.mxu2 %v5271_v9 }
 0xb45   : > { %v2968_v16 = vpop.f32.mrf.mxu0 }
 0xb47   : > { %3400 = vmatpush.bf16.msrb.mxu1 %v5262_v10  ;;  %3478 = vmatpush.bf16.msrb.mxu2 %v5270_v11 }
 0xb4b   : > { %3401 = vmatpush.bf16.msrb.mxu1 %v5261_v12  ;;  %3479 = vmatpush.bf16.msrb.mxu2 %v5269_v13 }
 0xb4f   : > { %3402 = vmatpush.bf16.msrb.mxu1 %v5260_v14  ;;  %3480 = vmatpush.bf16.msrb.mxu2 %v5268_v7 }
 0xb53   : > { %3403 = vmatpush.bf16.msrb.mxu1 %v5259_v15  ;;  %3481 = vmatpush.bf16.msrb.mxu2 %v5267_v19 }
 0xb57   : > { %3404 = vmatpush.bf16.msrb.mxu1 %v5258_v20  ;;  %3482 = vmatpush.bf16.msrb.mxu2 %v5266_v21 }
 0xbab   : > { %v2739_v8 = vpop.f32.mrf.mxu1 }
 0xbb3   : > { %v2741_v22 = vpop.f32.mrf.mxu1 }
 0xbb5   : > { %v2800_v23 = vpop.f32.mrf.mxu2  ;;  %v2879_v24 = vpop.f32.mrf.mxu3 }
 0xbb6   : > { %v2801_v25 = vadd.f32 %v2800_v23, %v2739_v8 }
 0xbb8   : > { %v2883_v27 = vadd.f32 %v2879_v24, %v2801_v25 }
 0xbba   : > { %v5943_v28 = vadd.f32 %v5383_v26, %v2883_v27 }
 0xbbc   : > { %v5947_v6 = vpack.c.bf16 %v5943_v28, %v5943_v28 }
 0xbbd   : > { %v2802_v29 = vpop.f32.mrf.mxu2  ;;  %v2881_v30 = vpop.f32.mrf.mxu3 }
 0xbbe   : > { %3043 = vmatmul.bf16.vlgmr.msra.gmra.mxu1 %v5947_v6  ;;  %3121 = vmatmul.bf16.vlgmr.msra.gmra.mxu2 %v5947_v6 }
 0xbce   : > { %3405 = vmatmul.bf16.vlgmr.msrb.gmra.mxu1 %v5932_v34  ;;  %3483 = vmatmul.bf16.vlgmr.msrb.gmra.mxu2 %v5932_v34  ;;  %v5246_v34 = vld [vmem:[#allocation8 + $0x120] sm:$0xff] }
 0xc3b   : > { %v3044_v31 = vpop.f32.mrf.mxu1 }
 0xc3c   : > { %v3127_v35 = vpack.c.bf16 %v3044_v31, %v3044_v31  ;;  %v5280_v31 = vld [vmem:[#allocation8 + $0x170] sm:$0xff] }
 0xc3e   : > { %3135 = vmatpush.bf16.xpose.msrb.mxu3 %v3127_v35  ;;  %v5278_v35 = vld [vmem:[#allocation8 + $0x160] sm:$0xff] }
 0xc41   : > { %v3122_v37 = vpop.f32.mrf.mxu2 }
 0xc42   : > { %v3154_v38 = vpack.c.bf16 %v3122_v37, %v3122_v37  ;;  %v5276_v37 = vld [vmem:[#allocation8 + $0x150] sm:$0xff] }
 0xc43   : > { %v3046_v33 = vpop.f32.mrf.mxu1 }
 0xc44   : > { %v3159_v42 = vsel %vm716_vm1, %v3154_v38, 0 }
 0xc45   : > { %3136 = vmatmul.bf16.vlgmr.msrb.gmra.mxu3 %v3126_v40  ;;  %3168 = vmatpush.bf16.msra.mxu0 %v3159_v42  ;;  %v5275_v40 = vld [vmem:[#allocation8 + $0x148] sm:$0xff] }
 0xc46   : > { %3240 = vmatpush.bf16.msra.mxu3 %v5249_v17  ;;  %v5279_v17 = vld [vmem:[#allocation8 + $0x168] sm:$0xff] }
 0xc49   : > { %v3124_v43 = vpop.f32.mrf.mxu2  ;;  %3319 = vmatpush.bf16.msrb.mxu0 %v5257_v57 }
 0xc4a   : > { %3241 = vmatpush.bf16.msra.mxu3 %v5248_v36  ;;  %v5277_v36 = vld [vmem:[#allocation8 + $0x158] sm:$0xff] }
 0xc4b   : > { %v3406_v44 = vpop.f32.mrf.mxu1 }
 0xc4c   : > { %v3489_v51 = vpack.c.bf16 %v3406_v44, %v3406_v44 }
 0xc4d   : > { %3320 = vmatpush.bf16.msrb.mxu0 %v5256_v3 }
 0xc4e   : > { %3242 = vmatpush.bf16.msra.mxu3 %v5247_v41 }
 0xc51   : > { %v3484_v47 = vpop.f32.mrf.mxu2  ;;  %3321 = vmatpush.bf16.msrb.mxu0 %v5255_v58 }
 0xc52   : > { %3243 = vmatpush.bf16.msra.mxu3 %v5246_v34  ;;  %v3516_v5 = vpack.c.bf16 %v3484_v47, %v3484_v47  ;;  %v5274_v34 = vld [vmem:[#allocation8 + $0x140] sm:$0xff] }
 0xc53   : > { %v3408_v48 = vpop.f32.mrf.mxu1 }
 0xc54   : > { %v3521_v11 = vsel %vm716_vm1, %v3516_v5, 0 }
 0xc55   : > { %3322 = vmatpush.bf16.msrb.mxu0 %v5254_v59 }
 0xc56   : > { %3244 = vmatpush.bf16.msra.mxu3 %v5245_v45 }
 0xc59   : > { %v3486_v18 = vpop.f32.mrf.mxu2  ;;  %3323 = vmatpush.bf16.msrb.mxu0 %v5253_v52 }
 0xc5a   : > { %3245 = vmatpush.bf16.msra.mxu3 %v5244_v46 }
 0xc5d   : > { %3324 = vmatpush.bf16.msrb.mxu0 %v5252_v63 }
 0xc5e   : > { %3246 = vmatpush.bf16.msra.mxu3 %v5243_v49 }
 0xc61   : > { %3325 = vmatpush.bf16.msrb.mxu0 %v5251_v0 }
 0xc62   : > { %3247 = vmatpush.bf16.msra.mxu3 %v5242_v50 }
 0xc65   : > { %3326 = vmatpush.bf16.msrb.mxu0 %v5250_v1 }
 0xc66   : > { %3497 = vmatpush.bf16.xpose.msrb.mxu3 %v3489_v51 }
 0xcc8   : > { %v3137_v53 = vpop.f32.mrf.mxu3 }
 0xcc9   : > { %v3141_v54 = vmul.f32 0.17677669, %v3137_v53 }
 0xccb   : > { %v3142_v55 = vsel %vm699_vm0, %v3141_v54, -inf }
 0xccc   : > { %3143 = vmax.xlane.f32.xlu2 %v3142_v55 }
 0xcd0   : > { %v3139_v56 = vpop.f32.mrf.mxu3 }
 0xd3f   : > { %v3144_v39 = vpop.xlane.xlu2 %3143 }
 0xd40   : > { %v3145_v60 = vsub.f32 %v3141_v54, %v3144_v39 }
 0xd42   : > { %v3146_v61 = vmul.f32 1.442695, %v3145_v60 }
 0xd44   : > { %5400 = vpow2.f32 %v3146_v61 }
 0xd4a   : > { %v5401_v16 = vpop.eup %5400 }
 0xd4b   : > { %v3148_v62 = vsel %vm699_vm0, %v5401_v16, 0.0 }
 0xd4c   : > { %3149 = vadd.xlane.f32.xlu0 %v3148_v62 }
 0xdbf   : > { %v3150_v2 = vpop.xlane.xlu0 %3149 }
 0xdc0   : > { %5402 = vrcp.f32 %v3150_v2 }
 0xdc6   : > { %v5403_v4 = vpop.eup %5402 }
 0xdc7   : > { %v3152_v9 = vmul.f32 %v5403_v4, %v5401_v16 }
 0xdc9   : > { %v3153_v10 = vpack.c.bf16 %v3152_v9, %v3152_v9 }
 0xdcb   : > { %4826 = vmatmul.msk.bf16.vlgmr.msra.gmra.mxu0 %vm699_vm0, %v3153_v10 }
 0xdcc   : > { %3530 = vmatpush.bf16.msra.mxu0 %v3521_v11 }
 0xddb   : > { %3327 = vmatmul.bf16.vlgmr.msrb.gmra.mxu0 %v5947_v6 }
 0xe48   : > { %v3170_v12 = vpop.f32.mrf.mxu0 }
 0xe49   : > { %v3174_v13 = vpack.c.bf16 %v3170_v12, %v3170_v12 }
 0xe4b   : > { %3248 = vmatmul.bf16.vlgmr.msra.gmra.mxu3 %v3174_v13 }
 0xe50   : > { %v3172_v14 = vpop.f32.mrf.mxu0 }
 0xe58   : > { %v3328_v7 = vpop.f32.mrf.mxu0 }
 0xe59   : > { %v3488_v15 = vpack.c.bf16 %v3328_v7, %v3328_v7 }
 0xe5b   : > { %3498 = vmatmul.bf16.vlgmr.msrb.gmra.mxu3 %v3488_v15 }
 0xe60   : > { %v3330_v19 = vpop.f32.mrf.mxu0 }
 0xece   : > { %v3249_v20 = vpop.f32.mrf.mxu3 }
 0xecf   : > { %v3253_v21 = vadd.f32 %v3249_v20, %v5928_v32  ;;  %v5281_v32 = vld [vmem:[#allocation8 + $0x178] sm:$0xff] }
 0xed0   : > { %3602 = vmatpush.bf16.msra.mxu1 %v5281_v32 }
 0xed1   : > { %3616 = vst [vmem:[%s5968_s11] sm:$0xff] %v3253_v21 }
 0xed4   : > { %3603 = vmatpush.bf16.msra.mxu1 %v5280_v31 }
 0xed6   : > { %v3251_v8 = vpop.f32.mrf.mxu3 }
 0xed8   : > { %3604 = vmatpush.bf16.msra.mxu1 %v5279_v17 }
 0xedc   : > { %3605 = vmatpush.bf16.msra.mxu1 %v5278_v35 }
 0xede   : > { %v3499_v22 = vpop.f32.mrf.mxu3 }
 0xedf   : > { %v3503_v23 = vmul.f32 0.17677669, %v3499_v22 }
 0xee0   : > { %3606 = vmatpush.bf16.msra.mxu1 %v5277_v36 }
 0xee1   : > { %v3504_v24 = vsel %vm699_vm0, %v3503_v23, -inf }
 0xee2   : > { %3505 = vmax.xlane.f32.xlu1 %v3504_v24 }
 0xee4   : > { %3607 = vmatpush.bf16.msra.mxu1 %v5276_v37 }
 0xee6   : > { %v3501_v25 = vpop.f32.mrf.mxu3 }
 0xee8   : > { %3608 = vmatpush.bf16.msra.mxu1 %v5275_v40 }
 0xeec   : > { %3609 = vmatpush.bf16.msra.mxu1 %v5274_v34 }
 0xf55   : > { %v3506_v26 = vpop.xlane.xlu1 %3505 }
 0xf56   : > { %v3507_v27 = vsub.f32 %v3503_v23, %v3506_v26 }
 0xf58   : > { %v3508_v6 = vmul.f32 1.442695, %v3507_v27 }
 0xf5a   : > { %5404 = vpow2.f32 %v3508_v6 }
 0xf60   : > { %v5405_v29 = vpop.eup %5404 }
 0xf61   : > { %v3510_v30 = vsel %vm699_vm0, %v5405_v29, 0.0 }
 0xf62   : > { %3511 = vadd.xlane.f32.xlu2 %v3510_v30 }
 0xfd5   : > { %v3512_v38 = vpop.xlane.xlu2 %3511 }
 0xfd6   : > { %5406 = vrcp.f32 %v3512_v38 }
 0xfdc   : > { %v5407_v33 = vpop.eup %5406 }
 0xfdd   : > { %v3514_v41 = vmul.f32 %v5407_v33, %v5405_v29 }
 0xfdf   : > { %v3515_v42 = vpack.c.bf16 %v3514_v41, %v3514_v41 }
 0xfe1   : > { %4955 = vmatmul.msk.bf16.vlgmr.msra.gmra.mxu0 %vm699_vm0, %v3515_v42 }
0x105e   : > { %v3532_v43 = vpop.f32.mrf.mxu0 }
0x105f   : > { %v3536_v44 = vpack.c.bf16 %v3532_v43, %v3532_v43 }
0x1061   : > { %3610 = vmatmul.bf16.vlgmr.msra.gmra.mxu1 %v3536_v44 }
0x1066   : > { %v3534_v45 = vpop.f32.mrf.mxu0 }
0x1067   : > { %5585 = shalt.err (!%p5582_p8)
}
0x1068   : > { %5302 = dma.vmem_to_hbm [thread:$0]  (%p5762_p5), %s3637_s16, 128, %s3639_s17, %s3619_s23  }
0x1069   : > { %s3648_s18 = scalar_lea.hbm %s6033_s9, %s4990_s15  ;;  %s430_s21 = scalar_lea.vmem [#allocation12], %s3821_s3 }
0x106a   : > { %s3650_s28 = sshll.u32 %s430_s21, 4  ;;  %s3652_s14 = sshll.u32 %s3648_s18, 4  ;;  %s3651_s28 = int_to_ptr.vmem [resolvable:$true] %s3650_s28  ;;  %s3653_s14 = int_to_ptr.hbm [resolvable:$true] %s3652_s14 }
0x106b   : > { %s3624_s29 = scalar_lea.sflag [#allocation13], %s5962_s5  ;;  %s5600_s24 = sshra.s32 %s3653_s14, 4  ;;  %s5601_s24 = int_to_ptr.hbm [resolvable:$true] %s5600_s24 }
0x106c   : > { %s5602_s22 = scalar_lea.hbm %s5601_s24, 8  ;;  %s5606_s3 = scalar_lea.hbm %s6033_s9, 16 }
0x106d   : > { %p5603_p9 = scmp.ne.s32.totalorder %s5601_s24, %s5602_s22  ;;  %p5607_p12 = scmp.lt.s32.totalorder %s5601_s24, %s6033_s9 }
0x106e   : > { %p5608_p13 = scmp.lt.s32.totalorder %s5606_s3, %s5602_s22 }
0x106f   : > { %p5604_p10 = pnand %p5603_p9, %p5762_p5 }
0x1070   : > { %p5609_p0 = por %p5608_p13, %p5607_p12 }
0x1071   : > { %p5605_p11 = pneg %p5604_p10 }
0x1073   : > { %p5610_p1 = pnand %p5609_p0, %p5605_p11 }
0x10de   : > { %v3611_v46 = vpop.f32.mrf.mxu1 }
0x10df   : > { %v3615_v47 = vadd.f32 %v3611_v46, %v5943_v28 }
0x10e1   : > { %3617 = vst [vmem:[%s430_s21] sm:$0xff] %v3615_v47 }
0x10e2   : > { %5613 = shalt.err (!%p5610_p1)
}
0x10e3   : > { %5303 = dma.vmem_to_hbm [thread:$0]  (%p5762_p5), %s3651_s28, 128, %s3653_s14, %s3624_s29  }
0x10e6   : > { %v3613_v28 = vpop.f32.mrf.mxu1 }
0x10e7 PF: > { %p5339_p2 = scmp.ge.s32.totalorder %s5664_s12, 2  ;;  %s3664_s5 = sand.u32 1, %s5652_s30  }
0x10e8   : > { %s3665_s13 = scalar_lea.sflag [#allocation4], %s3664_s5 }
0x10e9   : > { %p5323_p3 = pnand %p5339_p2, %p5766_p6 }
0x10eb   : > { %p5324_p4 = pneg %p5323_p3 }
0x10ed   : > { %5643 = dma.done.wait (%p5324_p4), %s3665_s13, 128  }
0x10ee   : > { %5645 = vsyncadd (%p5324_p4), %s3665_s13, 4294967168  ;;  %s3675_s25 = scalar_lea.sflag [#allocation13], %s3664_s5 }
0x10ef   : > { %5647 = dma.done.wait (%p5324_p4), %s3675_s25, 128  }
0x10f0   : > { %5649 = vsyncadd (%p5324_p4), %s3675_s25, 4294967168  ;;  %s6048_s12 = sld [smem:[#allocation20_spill]]  ;;  %s6051_s30 = smov %s5656_s10 }
0x10f1   : > { %s6049_s19 = sld [smem:[#allocation19_spill]] }
0x10f2   : > { %s6050_s11 = sld [smem:[#allocation21_spill]] }
0x10f6   : > { %p26_p5 = scmp.ge.s32.totalorder %s6048_s12, 4  }
0x10f7   : > { %s6052_s10 = smov %s6049_s19 }
0x10f8   :  { %28 = sbr.rel (!%p26_p5) target bundleno = 11 (0xb), region = 162 }
0x10fd   :  { %3681 = vsyncpa [#allocation3], 1 }
0x10fe   :  { %3683 = vsyncpa [#allocation3 + $0x1], 1 }
0x10ff   :  { %3684 = vsyncpa [#allocation6], 1 }
0x1100   :  { %3685 = vsyncpa [#allocation9], 1 }
0x1101   :  { %3686 = vsyncpa [#allocation4], 1 }
0x1102   :  { %3688 = vsyncpa [#allocation4 + $0x1], 1 }
0x1103   :  { %3689 = vsyncpa [#allocation13], 1 }
0x1104   :  { %3691 = vsyncpa [#allocation13 + $0x1], 1 }

</bundles_post_ra>
